<compile_context>
chip_gen: v7x
topology: tpu7x:2x2x1
jax: 0.10.0
libtpu: 0.0.40
codegen_flags: <defaults>
</compile_context>

<pallas_src>
import jax
import jax.numpy as jnp
import numpy as np
from jax import lax
from jax.experimental import pallas as pl
from jax.experimental.pallas import tpu as pltpu


def _round_up(n, m):
    return ((n + m - 1) // m) * m


def _divisor_tile(n, cap):
    """Largest divisor of n that is <= cap (always >= 1, never exceeds cap)."""
    cap = max(1, min(cap, n))
    for c in range(cap, 0, -1):
        if n % c == 0:
            return c
    return 1


def _batch_tiling(B, batch_tile):
    """Aligned (mult-of-8) batch tile; >=2 blocks when B>=16 (v7x megacore)."""
    BT = min(batch_tile, _round_up(B, 8))
    n_b = -(-B // BT)
    if n_b == 1 and B >= 16:
        n_b = 2
    BT = _round_up(-(-B // n_b), 8)   # rebalance so padding is minimal
    n_b = -(-B // BT)
    return BT, n_b


def _gru_kernel(x_ref, wih_ref, bpre_ref, whh_ref, bhhn_ref, wfc_ref, bfc_ref,
                out_ref, h_scratch, gates_scratch):
    tc = pl.program_id(1)
    n_tc = pl.num_programs(1)
    TT, BT, D = x_ref.shape
    Hp, G = whh_ref.shape            # G == 3 * Hp, Hp is a multiple of 128

    @pl.when(tc == 0)
    def _():
        h_scratch[...] = jnp.zeros_like(h_scratch)

    # ---- fused input projection for this time chunk (off the serial chain):
    # one (TT*BT, D) @ (D, 3Hp) MXU matmul, f32 accumulation, bias folded in.
    xs = x_ref[...].reshape(TT * BT, D)
    g = jnp.dot(xs, wih_ref[...], preferred_element_type=jnp.float32) + bpre_ref[...]
    gates_scratch[...] = g.reshape(TT, BT, G)

    # Hoisted constants (once per grid step, reused by every timestep).
    w_hh = whh_ref[...]                                   # (Hp, 3Hp) bf16
    b_hh_n_b = jnp.broadcast_to(bhhn_ref[...], (BT, Hp))  # (BT, Hp) f32

    def step(t, h):
        g_x = gates_scratch[t]                                        # (BT, 3Hp) f32
        g_h = jnp.dot(h.astype(w_hh.dtype), w_hh,
                      preferred_element_type=jnp.float32)             # (BT, 3Hp) f32
        # All slices at multiples of Hp (a 128-lane multiple) -> no relayout.
        rz = jax.nn.sigmoid(g_x[:, : 2 * Hp] + g_h[:, : 2 * Hp])
        r = rz[:, :Hp]
        z = rz[:, Hp:]
        # b_hh_n must stay inside the r*(...) term (PyTorch GRU semantics).
        n = jnp.tanh(g_x[:, 2 * Hp:] + r * (g_h[:, 2 * Hp:] + b_hh_n_b))
        return n + z * (h - n)                                         # == (1-z)n + z h

    h_new = lax.fori_loop(0, TT, step, h_scratch[...], unroll=min(TT, 8))
    h_scratch[...] = h_new

    @pl.when(tc == n_tc - 1)
    def _():
        # fc(H -> 1): VPU multiply + lane reduction instead of an N=1 MXU matmul.
        logit = jnp.sum(h_new * wfc_ref[...], axis=-1, keepdims=True) + bfc_ref[0, 0]
        out_ref[...] = jax.nn.sigmoid(logit).astype(out_ref.dtype)


def gru_win_predictor(x, params, *, time_chunk=128, batch_tile=128,
                      gates_vmem_bytes=8 * 1024 * 1024,
                      matmul_dtype=jnp.bfloat16):
    """x: (B, T, D) float32, params in PyTorch layout. Returns (B, 1) float32."""
    B, T, D = x.shape
    w_ih = params["weight_ih"]      # (3H, D), row blocks [r | z | n]
    w_hh = params["weight_hh"]      # (3H, H)
    b_ih = params["bias_ih"]        # (3H,)
    b_hh = params["bias_hh"]        # (3H,)
    H = w_hh.shape[1]
    Hp = _round_up(H, 128)          # pad each gate block to a 128-lane multiple
    G = 3 * Hp

    def pad_gate_cols(w):           # (..., 3H) -> (..., 3Hp), zero-padded per gate
        pad_width = [(0, 0)] * (w.ndim - 1) + [(0, Hp - H)]
        parts = [jnp.pad(w[..., i * H:(i + 1) * H], pad_width) for i in range(3)]
        return jnp.concatenate(parts, axis=-1)

    # ---- one-time parameter prep (outside the recurrent loop) ----
    w_ih_f = pad_gate_cols(w_ih.T).astype(matmul_dtype)                       # (D, 3Hp)
    w_hh_f = jnp.pad(pad_gate_cols(w_hh.T),
                     ((0, Hp - H), (0, 0))).astype(matmul_dtype)              # (Hp, 3Hp)
    # Fold b_hh's r/z parts into the precomputed bias; keep b_hh_n separate.
    b_pre = pad_gate_cols(jnp.concatenate(
        [b_ih[:2 * H] + b_hh[:2 * H], b_ih[2 * H:]]).reshape(1, 3 * H)
    ).astype(jnp.float32)                                                     # (1, 3Hp)
    b_hh_n = jnp.pad(b_hh[2 * H:], (0, Hp - H)).reshape(1, Hp).astype(jnp.float32)
    w_fc = jnp.pad(params["fc_weight"].reshape(1, H),
                   ((0, 0), (0, Hp - H))).astype(jnp.float32)                 # (1, Hp)
    b_fc = params["fc_bias"].reshape(1, 1).astype(jnp.float32)

    # ---- tiling ----
    BT, n_b = _batch_tiling(B, batch_tile)
    Bp = BT * n_b
    tt_cap = max(1, gates_vmem_bytes // (BT * G * 4))     # gates slab byte budget
    TT = _divisor_tile(T, min(time_chunk, tt_cap))
    n_tc = T // TT

    # ---- x stream: (T, Bp, D) bf16, transposed/padded once on the host side ----
    xt = jnp.transpose(x, (1, 0, 2))
    if Bp != B:
        xt = jnp.pad(xt, ((0, 0), (0, Bp - B), (0, 0)))
    xt = xt.astype(matmul_dtype)

    # ---- VMEM budget derived from the actual tiles (v7x: 64 MiB physical) ----
    x_blk = TT * BT * D * 2
    consts = D * G * 2 + G * 4 + Hp * G * 2 + Hp * 4 + Hp * 4
    scratch = BT * Hp * 4 + TT * BT * G * 4
    need = 2 * (x_blk + consts + BT * 4) + scratch
    vmem_limit = int(min(max(int(need * 1.25) + (4 << 20), 16 << 20), 56 << 20))

    const = lambda shape: pl.BlockSpec(shape, lambda b, t: (0,) * len(shape))

    out = pl.pallas_call(
        _gru_kernel,
        out_shape=jax.ShapeDtypeStruct((Bp, 1), jnp.float32),
        grid_spec=pltpu.PrefetchScalarGridSpec(
            num_scalar_prefetch=0,
            grid=(n_b, n_tc),
            in_specs=[
                pl.BlockSpec((TT, BT, D), lambda b, t: (t, b, 0)),   # x chunk stream
                const((D, G)),                                       # W_ih (padded)
                const((1, G)),                                       # fused bias
                const((Hp, G)),                                      # W_hh (padded)
                const((1, Hp)),                                      # b_hh_n
                const((1, Hp)),                                      # fc weight row
                pl.BlockSpec(memory_space=pltpu.MemorySpace.SMEM),   # fc bias scalar
            ],
            out_specs=pl.BlockSpec((BT, 1), lambda b, t: (b, 0)),
            scratch_shapes=[
                pltpu.VMEM((BT, Hp), jnp.float32),       # hidden state (resident)
                pltpu.VMEM((TT, BT, G), jnp.float32),    # per-chunk gates slab
            ],
        ),
        compiler_params=pltpu.CompilerParams(
            dimension_semantics=("parallel", "arbitrary"),   # batch parallel, time serial
            vmem_limit_bytes=vmem_limit,
        ),
    )(xt, w_ih_f, b_pre, w_hh_f, b_hh_n, w_fc, b_fc)
    return out[:B]


def init_params(key, input_dim, hidden_dim):
    """PyTorch-layout params, U(-1/sqrt(H), 1/sqrt(H)) like nn.GRU / nn.Linear."""
    k = 1.0 / np.sqrt(hidden_dim)
    ks = jax.random.split(key, 6)
    u = lambda kk, shape: jax.random.uniform(kk, shape, jnp.float32, -k, k)
    return {
        "weight_ih": u(ks[0], (3 * hidden_dim, input_dim)),   # rows [r | z | n]
        "weight_hh": u(ks[1], (3 * hidden_dim, hidden_dim)),
        "bias_ih":   u(ks[2], (3 * hidden_dim,)),
        "bias_hh":   u(ks[3], (3 * hidden_dim,)),
        "fc_weight": u(ks[4], (1, hidden_dim)),
        "fc_bias":   u(ks[5], (1,)),
    }


def reference(x, p):
    """Pure-JAX f32 reference of the same forward pass (PyTorch GRU semantics)."""
    B, T, D = x.shape
    H = p["weight_hh"].shape[1]
    w_ih, w_hh = p["weight_ih"], p["weight_hh"]
    b_ih, b_hh = p["bias_ih"], p["bias_hh"]

    def step(h, x_t):
        gi = x_t @ w_ih.T + b_ih
        gh = h @ w_hh.T + b_hh
        i_r, i_z, i_n = gi[:, :H], gi[:, H:2 * H], gi[:, 2 * H:]
        h_r, h_z, h_n = gh[:, :H], gh[:, H:2 * H], gh[:, 2 * H:]
        r = jax.nn.sigmoid(i_r + h_r)
        z = jax.nn.sigmoid(i_z + h_z)
        n = jnp.tanh(i_n + r * h_n)
        return (1.0 - z) * n + z * h, None

    h0 = jnp.zeros((B, H), jnp.float32)
    h_last, _ = lax.scan(step, h0, jnp.transpose(x, (1, 0, 2)))
    return jax.nn.sigmoid(h_last @ p["fc_weight"].T + p["fc_bias"])


if __name__ == "__main__":
    key = jax.random.PRNGKey(0)
    k1, k2, k3, k4 = jax.random.split(key, 4)

    # Primary small config (module default hidden_dim=64).
    B, T, D, H = 2, 8, 16, 64
    x = jax.random.normal(k1, (B, T, D), jnp.float32)
    params = init_params(k2, D, H)
    out = jax.block_until_ready(jax.jit(gru_win_predictor)(x, params))
    np.testing.assert_allclose(np.asarray(out), np.asarray(reference(x, params)),
                               rtol=1e-2, atol=1e-2)

    # Second config exercising gate padding (H=96->Hp=128), ragged B and 2 batch blocks.
    B2, T2, D2, H2 = 20, 12, 16, 96
    x2 = jax.random.normal(k3, (B2, T2, D2), jnp.float32)
    p2 = init_params(k4, D2, H2)
    out2 = jax.block_until_ready(jax.jit(gru_win_predictor)(x2, p2))
    np.testing.assert_allclose(np.asarray(out2), np.asarray(reference(x2, p2)),
                               rtol=1e-2, atol=1e-2)

    print("KERNEL_OK")
</pallas_src>

<mosaic_0001>
module attributes {stable_mosaic.version = 11 : i64} {
  func.func @_gru_kernel(%arg0: i32, %arg1: i32, %arg2: memref<8x8x16xbf16, #tpu.memory_space<vmem>>, %arg3: memref<16x384xbf16, #tpu.memory_space<vmem>>, %arg4: memref<1x384xf32, #tpu.memory_space<vmem>>, %arg5: memref<128x384xbf16, #tpu.memory_space<vmem>>, %arg6: memref<1x128xf32, #tpu.memory_space<vmem>>, %arg7: memref<1x128xf32, #tpu.memory_space<vmem>>, %arg8: memref<1x1xf32, #tpu.memory_space<smem>>, %arg9: memref<8x1xf32, #tpu.memory_space<vmem>>, %arg10: memref<8x128xf32, #tpu.memory_space<vmem>>, %arg11: memref<8x8x384xf32, #tpu.memory_space<vmem>>) attributes {dimension_semantics = [#tpu.dimension_semantics<parallel>, #tpu.dimension_semantics<arbitrary>], iteration_bounds = array<i64: 1, 1>, scalar_prefetch = 0 : i64, scratch_operands = 2 : i64, tpu.core_type = #tpu.core_type<tc>, window_params = [{transform_indices = @transform_0, window_bounds = array<i64: 8, 8, 16>}, {pipeline_mode = #tpu.pipeline_mode<synchronous>, transform_indices = @transform_1, window_bounds = array<i64: 16, 384>}, {pipeline_mode = #tpu.pipeline_mode<synchronous>, transform_indices = @transform_2, window_bounds = array<i64: 1, 384>}, {pipeline_mode = #tpu.pipeline_mode<synchronous>, transform_indices = @transform_3, window_bounds = array<i64: 128, 384>}, {pipeline_mode = #tpu.pipeline_mode<synchronous>, transform_indices = @transform_4, window_bounds = array<i64: 1, 128>}, {pipeline_mode = #tpu.pipeline_mode<synchronous>, transform_indices = @transform_5, window_bounds = array<i64: 1, 128>}, {transform_indices = @transform_6, window_bounds = array<i64: 1, 1>}, {transform_indices = @transform_7, window_bounds = array<i64: 8, 1>}]} {
    %c0_i32 = arith.constant 0 : i32
    %0 = arith.cmpi eq, %arg1, %c0_i32 : i32
    %1 = arith.extui %0 : i1 to i32
    %c0_i32_0 = arith.constant 0 : i32
    %2 = arith.cmpi ne, %1, %c0_i32_0 : i32
    scf.if %2 {
      %cst_53 = arith.constant 0.000000e+00 : f32
      %213 = vector.broadcast %cst_53 : f32 to vector<8x128xf32>
      %c0_54 = arith.constant 0 : index
      %c0_55 = arith.constant 0 : index
      %214 = vector.load %arg10[%c0_54, %c0_55] : memref<8x128xf32, #tpu.memory_space<vmem>>, vector<8x128xf32>
      tpu.vector_store %arg10[%c0_54, %c0_55], %213 {strides = array<i32>} : memref<8x128xf32, #tpu.memory_space<vmem>>, vector<8x128xf32>,
    } else {
    }
    %c0 = arith.constant 0 : index
    %c0_1 = arith.constant 0 : index
    %c0_2 = arith.constant 0 : index
    %3 = vector.load %arg2[%c0, %c0_1, %c0_2] : memref<8x8x16xbf16, #tpu.memory_space<vmem>>, vector<8x8x16xbf16>
    %4 = vector.shape_cast %3 : vector<8x8x16xbf16> to vector<64x16xbf16>
    %c0_3 = arith.constant 0 : index
    %c0_4 = arith.constant 0 : index
    %5 = vector.load %arg3[%c0_3, %c0_4] : memref<16x384xbf16, #tpu.memory_space<vmem>>, vector<16x384xbf16>
    %cst = arith.constant dense<0.000000e+00> : vector<64x384xf32>
    %6 = tpu.matmul %4, %5, %cst {dimension_numbers = #tpu.dot_dimension_numbers<[1], [0], [0], [1], [0, 0, 1, 1], [], []>} : vector<64x16xbf16>, vector<16x384xbf16>, vector<64x384xf32> -> vector<64x384xf32>
    %c0_5 = arith.constant 0 : index
    %c0_6 = arith.constant 0 : index
    %7 = vector.load %arg4[%c0_5, %c0_6] : memref<1x384xf32, #tpu.memory_space<vmem>>, vector<1x384xf32>
    %8 = vector.broadcast %7 : vector<1x384xf32> to vector<64x384xf32>
    %9 = arith.addf %6, %8 : vector<64x384xf32>
    %10 = vector.shape_cast %9 : vector<64x384xf32> to vector<8x8x384xf32>
    %c0_7 = arith.constant 0 : index
    %c0_8 = arith.constant 0 : index
    %c0_9 = arith.constant 0 : index
    %11 = vector.load %arg11[%c0_7, %c0_8, %c0_9] : memref<8x8x384xf32, #tpu.memory_space<vmem>>, vector<8x8x384xf32>
    tpu.vector_store %arg11[%c0_7, %c0_8, %c0_9], %10 {strides = array<i32>} : memref<8x8x384xf32, #tpu.memory_space<vmem>>, vector<8x8x384xf32>,
    %c0_10 = arith.constant 0 : index
    %c0_11 = arith.constant 0 : index
    %12 = vector.load %arg5[%c0_10, %c0_11] : memref<128x384xbf16, #tpu.memory_space<vmem>>, vector<128x384xbf16>
    %c0_12 = arith.constant 0 : index
    %c0_13 = arith.constant 0 : index
    %13 = vector.load %arg6[%c0_12, %c0_13] : memref<1x128xf32, #tpu.memory_space<vmem>>, vector<1x128xf32>
    %14 = vector.shape_cast %13 : vector<1x128xf32> to vector<1x128xf32>
    %15 = vector.broadcast %14 : vector<1x128xf32> to vector<8x128xf32>
    %c0_14 = arith.constant 0 : index
    %c0_15 = arith.constant 0 : index
    %16 = vector.load %arg10[%c0_14, %c0_15] : memref<8x128xf32, #tpu.memory_space<vmem>>, vector<8x128xf32>
    %c0_i32_16 = arith.constant 0 : i32
    %17 = arith.index_cast %c0_i32_16 : i32 to index
    %c0_17 = arith.constant 0 : index
    %c0_18 = arith.constant 0 : index
    %18 = vector.load %arg11[%17, %c0_17, %c0_18] : memref<8x8x384xf32, #tpu.memory_space<vmem>>, vector<1x8x384xf32>
    %19 = vector.shape_cast %18 : vector<1x8x384xf32> to vector<8x384xf32>
    %20 = arith.truncf %16 : vector<8x128xf32> to vector<8x128xbf16>
    %cst_19 = arith.constant dense<0.000000e+00> : vector<8x384xf32>
    %21 = tpu.matmul %20, %12, %cst_19 {dimension_numbers = #tpu.dot_dimension_numbers<[1], [0], [0], [1], [0, 0, 1, 1], [], []>} : vector<8x128xbf16>, vector<128x384xbf16>, vector<8x384xf32> -> vector<8x384xf32>
    %22 = vector.extract_strided_slice %19 {offsets = [0, 0], sizes = [8, 256], strides = [1, 1]} : vector<8x384xf32> to vector<8x256xf32>
    %23 = vector.extract_strided_slice %21 {offsets = [0, 0], sizes = [8, 256], strides = [1, 1]} : vector<8x384xf32> to vector<8x256xf32>
    %24 = arith.addf %22, %23 : vector<8x256xf32>
    %25 = arith.negf %24 : vector<8x256xf32>
    %26 = math.exp %25 : vector<8x256xf32>
    %cst_20 = arith.constant 1.000000e+00 : f32
    %27 = vector.broadcast %cst_20 : f32 to vector<8x256xf32>
    %28 = arith.addf %27, %26 : vector<8x256xf32>
    %29 = arith.divf %27, %28 : vector<8x256xf32>
    %30 = vector.extract_strided_slice %29 {offsets = [0, 0], sizes = [8, 128], strides = [1, 1]} : vector<8x256xf32> to vector<8x128xf32>
    %31 = vector.extract_strided_slice %29 {offsets = [0, 128], sizes = [8, 128], strides = [1, 1]} : vector<8x256xf32> to vector<8x128xf32>
    %32 = vector.extract_strided_slice %19 {offsets = [0, 256], sizes = [8, 128], strides = [1, 1]} : vector<8x384xf32> to vector<8x128xf32>
    %33 = vector.extract_strided_slice %21 {offsets = [0, 256], sizes = [8, 128], strides = [1, 1]} : vector<8x384xf32> to vector<8x128xf32>
    %34 = arith.addf %33, %15 : vector<8x128xf32>
    %35 = arith.mulf %30, %34 : vector<8x128xf32>
    %36 = arith.addf %32, %35 : vector<8x128xf32>
    %37 = math.tanh %36 : vector<8x128xf32>
    %38 = arith.subf %16, %37 : vector<8x128xf32>
    %39 = arith.mulf %31, %38 : vector<8x128xf32>
    %40 = arith.addf %37, %39 : vector<8x128xf32>
    %c1_i32 = arith.constant 1 : i32
    %41 = arith.index_cast %c1_i32 : i32 to index
    %c0_21 = arith.constant 0 : index
    %c0_22 = arith.constant 0 : index
    %42 = vector.load %arg11[%41, %c0_21, %c0_22] : memref<8x8x384xf32, #tpu.memory_space<vmem>>, vector<1x8x384xf32>
    %43 = vector.shape_cast %42 : vector<1x8x384xf32> to vector<8x384xf32>
    %44 = arith.truncf %40 : vector<8x128xf32> to vector<8x128xbf16>
    %cst_23 = arith.constant dense<0.000000e+00> : vector<8x384xf32>
    %45 = tpu.matmul %44, %12, %cst_23 {dimension_numbers = #tpu.dot_dimension_numbers<[1], [0], [0], [1], [0, 0, 1, 1], [], []>} : vector<8x128xbf16>, vector<128x384xbf16>, vector<8x384xf32> -> vector<8x384xf32>
    %46 = vector.extract_strided_slice %43 {offsets = [0, 0], sizes = [8, 256], strides = [1, 1]} : vector<8x384xf32> to vector<8x256xf32>
    %47 = vector.extract_strided_slice %45 {offsets = [0, 0], sizes = [8, 256], strides = [1, 1]} : vector<8x384xf32> to vector<8x256xf32>
    %48 = arith.addf %46, %47 : vector<8x256xf32>
    %49 = arith.negf %48 : vector<8x256xf32>
    %50 = math.exp %49 : vector<8x256xf32>
    %cst_24 = arith.constant 1.000000e+00 : f32
    %51 = vector.broadcast %cst_24 : f32 to vector<8x256xf32>
    %52 = arith.addf %51, %50 : vector<8x256xf32>
    %53 = arith.divf %51, %52 : vector<8x256xf32>
    %54 = vector.extract_strided_slice %53 {offsets = [0, 0], sizes = [8, 128], strides = [1, 1]} : vector<8x256xf32> to vector<8x128xf32>
    %55 = vector.extract_strided_slice %53 {offsets = [0, 128], sizes = [8, 128], strides = [1, 1]} : vector<8x256xf32> to vector<8x128xf32>
    %56 = vector.extract_strided_slice %43 {offsets = [0, 256], sizes = [8, 128], strides = [1, 1]} : vector<8x384xf32> to vector<8x128xf32>
    %57 = vector.extract_strided_slice %45 {offsets = [0, 256], sizes = [8, 128], strides = [1, 1]} : vector<8x384xf32> to vector<8x128xf32>
    %58 = arith.addf %57, %15 : vector<8x128xf32>
    %59 = arith.mulf %54, %58 : vector<8x128xf32>
    %60 = arith.addf %56, %59 : vector<8x128xf32>
    %61 = math.tanh %60 : vector<8x128xf32>
    %62 = arith.subf %40, %61 : vector<8x128xf32>
    %63 = arith.mulf %55, %62 : vector<8x128xf32>
    %64 = arith.addf %61, %63 : vector<8x128xf32>
    %c2_i32 = arith.constant 2 : i32
    %65 = arith.index_cast %c2_i32 : i32 to index
    %c0_25 = arith.constant 0 : index
    %c0_26 = arith.constant 0 : index
    %66 = vector.load %arg11[%65, %c0_25, %c0_26] : memref<8x8x384xf32, #tpu.memory_space<vmem>>, vector<1x8x384xf32>
    %67 = vector.shape_cast %66 : vector<1x8x384xf32> to vector<8x384xf32>
    %68 = arith.truncf %64 : vector<8x128xf32> to vector<8x128xbf16>
    %cst_27 = arith.constant dense<0.000000e+00> : vector<8x384xf32>
    %69 = tpu.matmul %68, %12, %cst_27 {dimension_numbers = #tpu.dot_dimension_numbers<[1], [0], [0], [1], [0, 0, 1, 1], [], []>} : vector<8x128xbf16>, vector<128x384xbf16>, vector<8x384xf32> -> vector<8x384xf32>
    %70 = vector.extract_strided_slice %67 {offsets = [0, 0], sizes = [8, 256], strides = [1, 1]} : vector<8x384xf32> to vector<8x256xf32>
    %71 = vector.extract_strided_slice %69 {offsets = [0, 0], sizes = [8, 256], strides = [1, 1]} : vector<8x384xf32> to vector<8x256xf32>
    %72 = arith.addf %70, %71 : vector<8x256xf32>
    %73 = arith.negf %72 : vector<8x256xf32>
    %74 = math.exp %73 : vector<8x256xf32>
    %cst_28 = arith.constant 1.000000e+00 : f32
    %75 = vector.broadcast %cst_28 : f32 to vector<8x256xf32>
    %76 = arith.addf %75, %74 : vector<8x256xf32>
    %77 = arith.divf %75, %76 : vector<8x256xf32>
    %78 = vector.extract_strided_slice %77 {offsets = [0, 0], sizes = [8, 128], strides = [1, 1]} : vector<8x256xf32> to vector<8x128xf32>
    %79 = vector.extract_strided_slice %77 {offsets = [0, 128], sizes = [8, 128], strides = [1, 1]} : vector<8x256xf32> to vector<8x128xf32>
    %80 = vector.extract_strided_slice %67 {offsets = [0, 256], sizes = [8, 128], strides = [1, 1]} : vector<8x384xf32> to vector<8x128xf32>
    %81 = vector.extract_strided_slice %69 {offsets = [0, 256], sizes = [8, 128], strides = [1, 1]} : vector<8x384xf32> to vector<8x128xf32>
    %82 = arith.addf %81, %15 : vector<8x128xf32>
    %83 = arith.mulf %78, %82 : vector<8x128xf32>
    %84 = arith.addf %80, %83 : vector<8x128xf32>
    %85 = math.tanh %84 : vector<8x128xf32>
    %86 = arith.subf %64, %85 : vector<8x128xf32>
    %87 = arith.mulf %79, %86 : vector<8x128xf32>
    %88 = arith.addf %85, %87 : vector<8x128xf32>
    %c3_i32 = arith.constant 3 : i32
    %89 = arith.index_cast %c3_i32 : i32 to index
    %c0_29 = arith.constant 0 : index
    %c0_30 = arith.constant 0 : index
    %90 = vector.load %arg11[%89, %c0_29, %c0_30] : memref<8x8x384xf32, #tpu.memory_space<vmem>>, vector<1x8x384xf32>
    %91 = vector.shape_cast %90 : vector<1x8x384xf32> to vector<8x384xf32>
    %92 = arith.truncf %88 : vector<8x128xf32> to vector<8x128xbf16>
    %cst_31 = arith.constant dense<0.000000e+00> : vector<8x384xf32>
    %93 = tpu.matmul %92, %12, %cst_31 {dimension_numbers = #tpu.dot_dimension_numbers<[1], [0], [0], [1], [0, 0, 1, 1], [], []>} : vector<8x128xbf16>, vector<128x384xbf16>, vector<8x384xf32> -> vector<8x384xf32>
    %94 = vector.extract_strided_slice %91 {offsets = [0, 0], sizes = [8, 256], strides = [1, 1]} : vector<8x384xf32> to vector<8x256xf32>
    %95 = vector.extract_strided_slice %93 {offsets = [0, 0], sizes = [8, 256], strides = [1, 1]} : vector<8x384xf32> to vector<8x256xf32>
    %96 = arith.addf %94, %95 : vector<8x256xf32>
    %97 = arith.negf %96 : vector<8x256xf32>
    %98 = math.exp %97 : vector<8x256xf32>
    %cst_32 = arith.constant 1.000000e+00 : f32
    %99 = vector.broadcast %cst_32 : f32 to vector<8x256xf32>
    %100 = arith.addf %99, %98 : vector<8x256xf32>
    %101 = arith.divf %99, %100 : vector<8x256xf32>
    %102 = vector.extract_strided_slice %101 {offsets = [0, 0], sizes = [8, 128], strides = [1, 1]} : vector<8x256xf32> to vector<8x128xf32>
    %103 = vector.extract_strided_slice %101 {offsets = [0, 128], sizes = [8, 128], strides = [1, 1]} : vector<8x256xf32> to vector<8x128xf32>
    %104 = vector.extract_strided_slice %91 {offsets = [0, 256], sizes = [8, 128], strides = [1, 1]} : vector<8x384xf32> to vector<8x128xf32>
    %105 = vector.extract_strided_slice %93 {offsets = [0, 256], sizes = [8, 128], strides = [1, 1]} : vector<8x384xf32> to vector<8x128xf32>
    %106 = arith.addf %105, %15 : vector<8x128xf32>
    %107 = arith.mulf %102, %106 : vector<8x128xf32>
    %108 = arith.addf %104, %107 : vector<8x128xf32>
    %109 = math.tanh %108 : vector<8x128xf32>
    %110 = arith.subf %88, %109 : vector<8x128xf32>
    %111 = arith.mulf %103, %110 : vector<8x128xf32>
    %112 = arith.addf %109, %111 : vector<8x128xf32>
    %c4_i32 = arith.constant 4 : i32
    %113 = arith.index_cast %c4_i32 : i32 to index
    %c0_33 = arith.constant 0 : index
    %c0_34 = arith.constant 0 : index
    %114 = vector.load %arg11[%113, %c0_33, %c0_34] : memref<8x8x384xf32, #tpu.memory_space<vmem>>, vector<1x8x384xf32>
    %115 = vector.shape_cast %114 : vector<1x8x384xf32> to vector<8x384xf32>
    %116 = arith.truncf %112 : vector<8x128xf32> to vector<8x128xbf16>
    %cst_35 = arith.constant dense<0.000000e+00> : vector<8x384xf32>
    %117 = tpu.matmul %116, %12, %cst_35 {dimension_numbers = #tpu.dot_dimension_numbers<[1], [0], [0], [1], [0, 0, 1, 1], [], []>} : vector<8x128xbf16>, vector<128x384xbf16>, vector<8x384xf32> -> vector<8x384xf32>
    %118 = vector.extract_strided_slice %115 {offsets = [0, 0], sizes = [8, 256], strides = [1, 1]} : vector<8x384xf32> to vector<8x256xf32>
    %119 = vector.extract_strided_slice %117 {offsets = [0, 0], sizes = [8, 256], strides = [1, 1]} : vector<8x384xf32> to vector<8x256xf32>
    %120 = arith.addf %118, %119 : vector<8x256xf32>
    %121 = arith.negf %120 : vector<8x256xf32>
    %122 = math.exp %121 : vector<8x256xf32>
    %cst_36 = arith.constant 1.000000e+00 : f32
    %123 = vector.broadcast %cst_36 : f32 to vector<8x256xf32>
    %124 = arith.addf %123, %122 : vector<8x256xf32>
    %125 = arith.divf %123, %124 : vector<8x256xf32>
    %126 = vector.extract_strided_slice %125 {offsets = [0, 0], sizes = [8, 128], strides = [1, 1]} : vector<8x256xf32> to vector<8x128xf32>
    %127 = vector.extract_strided_slice %125 {offsets = [0, 128], sizes = [8, 128], strides = [1, 1]} : vector<8x256xf32> to vector<8x128xf32>
    %128 = vector.extract_strided_slice %115 {offsets = [0, 256], sizes = [8, 128], strides = [1, 1]} : vector<8x384xf32> to vector<8x128xf32>
    %129 = vector.extract_strided_slice %117 {offsets = [0, 256], sizes = [8, 128], strides = [1, 1]} : vector<8x384xf32> to vector<8x128xf32>
    %130 = arith.addf %129, %15 : vector<8x128xf32>
    %131 = arith.mulf %126, %130 : vector<8x128xf32>
    %132 = arith.addf %128, %131 : vector<8x128xf32>
    %133 = math.tanh %132 : vector<8x128xf32>
    %134 = arith.subf %112, %133 : vector<8x128xf32>
    %135 = arith.mulf %127, %134 : vector<8x128xf32>
    %136 = arith.addf %133, %135 : vector<8x128xf32>
    %c5_i32 = arith.constant 5 : i32
    %137 = arith.index_cast %c5_i32 : i32 to index
    %c0_37 = arith.constant 0 : index
    %c0_38 = arith.constant 0 : index
    %138 = vector.load %arg11[%137, %c0_37, %c0_38] : memref<8x8x384xf32, #tpu.memory_space<vmem>>, vector<1x8x384xf32>
    %139 = vector.shape_cast %138 : vector<1x8x384xf32> to vector<8x384xf32>
    %140 = arith.truncf %136 : vector<8x128xf32> to vector<8x128xbf16>
    %cst_39 = arith.constant dense<0.000000e+00> : vector<8x384xf32>
    %141 = tpu.matmul %140, %12, %cst_39 {dimension_numbers = #tpu.dot_dimension_numbers<[1], [0], [0], [1], [0, 0, 1, 1], [], []>} : vector<8x128xbf16>, vector<128x384xbf16>, vector<8x384xf32> -> vector<8x384xf32>
    %142 = vector.extract_strided_slice %139 {offsets = [0, 0], sizes = [8, 256], strides = [1, 1]} : vector<8x384xf32> to vector<8x256xf32>
    %143 = vector.extract_strided_slice %141 {offsets = [0, 0], sizes = [8, 256], strides = [1, 1]} : vector<8x384xf32> to vector<8x256xf32>
    %144 = arith.addf %142, %143 : vector<8x256xf32>
    %145 = arith.negf %144 : vector<8x256xf32>
    %146 = math.exp %145 : vector<8x256xf32>
    %cst_40 = arith.constant 1.000000e+00 : f32
    %147 = vector.broadcast %cst_40 : f32 to vector<8x256xf32>
    %148 = arith.addf %147, %146 : vector<8x256xf32>
    %149 = arith.divf %147, %148 : vector<8x256xf32>
    %150 = vector.extract_strided_slice %149 {offsets = [0, 0], sizes = [8, 128], strides = [1, 1]} : vector<8x256xf32> to vector<8x128xf32>
    %151 = vector.extract_strided_slice %149 {offsets = [0, 128], sizes = [8, 128], strides = [1, 1]} : vector<8x256xf32> to vector<8x128xf32>
    %152 = vector.extract_strided_slice %139 {offsets = [0, 256], sizes = [8, 128], strides = [1, 1]} : vector<8x384xf32> to vector<8x128xf32>
    %153 = vector.extract_strided_slice %141 {offsets = [0, 256], sizes = [8, 128], strides = [1, 1]} : vector<8x384xf32> to vector<8x128xf32>
    %154 = arith.addf %153, %15 : vector<8x128xf32>
    %155 = arith.mulf %150, %154 : vector<8x128xf32>
    %156 = arith.addf %152, %155 : vector<8x128xf32>
    %157 = math.tanh %156 : vector<8x128xf32>
    %158 = arith.subf %136, %157 : vector<8x128xf32>
    %159 = arith.mulf %151, %158 : vector<8x128xf32>
    %160 = arith.addf %157, %159 : vector<8x128xf32>
    %c6_i32 = arith.constant 6 : i32
    %161 = arith.index_cast %c6_i32 : i32 to index
    %c0_41 = arith.constant 0 : index
    %c0_42 = arith.constant 0 : index
    %162 = vector.load %arg11[%161, %c0_41, %c0_42] : memref<8x8x384xf32, #tpu.memory_space<vmem>>, vector<1x8x384xf32>
    %163 = vector.shape_cast %162 : vector<1x8x384xf32> to vector<8x384xf32>
    %164 = arith.truncf %160 : vector<8x128xf32> to vector<8x128xbf16>
    %cst_43 = arith.constant dense<0.000000e+00> : vector<8x384xf32>
    %165 = tpu.matmul %164, %12, %cst_43 {dimension_numbers = #tpu.dot_dimension_numbers<[1], [0], [0], [1], [0, 0, 1, 1], [], []>} : vector<8x128xbf16>, vector<128x384xbf16>, vector<8x384xf32> -> vector<8x384xf32>
    %166 = vector.extract_strided_slice %163 {offsets = [0, 0], sizes = [8, 256], strides = [1, 1]} : vector<8x384xf32> to vector<8x256xf32>
    %167 = vector.extract_strided_slice %165 {offsets = [0, 0], sizes = [8, 256], strides = [1, 1]} : vector<8x384xf32> to vector<8x256xf32>
    %168 = arith.addf %166, %167 : vector<8x256xf32>
    %169 = arith.negf %168 : vector<8x256xf32>
    %170 = math.exp %169 : vector<8x256xf32>
    %cst_44 = arith.constant 1.000000e+00 : f32
    %171 = vector.broadcast %cst_44 : f32 to vector<8x256xf32>
    %172 = arith.addf %171, %170 : vector<8x256xf32>
    %173 = arith.divf %171, %172 : vector<8x256xf32>
    %174 = vector.extract_strided_slice %173 {offsets = [0, 0], sizes = [8, 128], strides = [1, 1]} : vector<8x256xf32> to vector<8x128xf32>
    %175 = vector.extract_strided_slice %173 {offsets = [0, 128], sizes = [8, 128], strides = [1, 1]} : vector<8x256xf32> to vector<8x128xf32>
    %176 = vector.extract_strided_slice %163 {offsets = [0, 256], sizes = [8, 128], strides = [1, 1]} : vector<8x384xf32> to vector<8x128xf32>
    %177 = vector.extract_strided_slice %165 {offsets = [0, 256], sizes = [8, 128], strides = [1, 1]} : vector<8x384xf32> to vector<8x128xf32>
    %178 = arith.addf %177, %15 : vector<8x128xf32>
    %179 = arith.mulf %174, %178 : vector<8x128xf32>
    %180 = arith.addf %176, %179 : vector<8x128xf32>
    %181 = math.tanh %180 : vector<8x128xf32>
    %182 = arith.subf %160, %181 : vector<8x128xf32>
    %183 = arith.mulf %175, %182 : vector<8x128xf32>
    %184 = arith.addf %181, %183 : vector<8x128xf32>
    %c7_i32 = arith.constant 7 : i32
    %185 = arith.index_cast %c7_i32 : i32 to index
    %c0_45 = arith.constant 0 : index
    %c0_46 = arith.constant 0 : index
    %186 = vector.load %arg11[%185, %c0_45, %c0_46] : memref<8x8x384xf32, #tpu.memory_space<vmem>>, vector<1x8x384xf32>
    %187 = vector.shape_cast %186 : vector<1x8x384xf32> to vector<8x384xf32>
    %188 = arith.truncf %184 : vector<8x128xf32> to vector<8x128xbf16>
    %cst_47 = arith.constant dense<0.000000e+00> : vector<8x384xf32>
    %189 = tpu.matmul %188, %12, %cst_47 {dimension_numbers = #tpu.dot_dimension_numbers<[1], [0], [0], [1], [0, 0, 1, 1], [], []>} : vector<8x128xbf16>, vector<128x384xbf16>, vector<8x384xf32> -> vector<8x384xf32>
    %190 = vector.extract_strided_slice %187 {offsets = [0, 0], sizes = [8, 256], strides = [1, 1]} : vector<8x384xf32> to vector<8x256xf32>
    %191 = vector.extract_strided_slice %189 {offsets = [0, 0], sizes = [8, 256], strides = [1, 1]} : vector<8x384xf32> to vector<8x256xf32>
    %192 = arith.addf %190, %191 : vector<8x256xf32>
    %193 = arith.negf %192 : vector<8x256xf32>
    %194 = math.exp %193 : vector<8x256xf32>
    %cst_48 = arith.constant 1.000000e+00 : f32
    %195 = vector.broadcast %cst_48 : f32 to vector<8x256xf32>
    %196 = arith.addf %195, %194 : vector<8x256xf32>
    %197 = arith.divf %195, %196 : vector<8x256xf32>
    %198 = vector.extract_strided_slice %197 {offsets = [0, 0], sizes = [8, 128], strides = [1, 1]} : vector<8x256xf32> to vector<8x128xf32>
    %199 = vector.extract_strided_slice %197 {offsets = [0, 128], sizes = [8, 128], strides = [1, 1]} : vector<8x256xf32> to vector<8x128xf32>
    %200 = vector.extract_strided_slice %187 {offsets = [0, 256], sizes = [8, 128], strides = [1, 1]} : vector<8x384xf32> to vector<8x128xf32>
    %201 = vector.extract_strided_slice %189 {offsets = [0, 256], sizes = [8, 128], strides = [1, 1]} : vector<8x384xf32> to vector<8x128xf32>
    %202 = arith.addf %201, %15 : vector<8x128xf32>
    %203 = arith.mulf %198, %202 : vector<8x128xf32>
    %204 = arith.addf %200, %203 : vector<8x128xf32>
    %205 = math.tanh %204 : vector<8x128xf32>
    %206 = arith.subf %184, %205 : vector<8x128xf32>
    %207 = arith.mulf %199, %206 : vector<8x128xf32>
    %208 = arith.addf %205, %207 : vector<8x128xf32>
    %c8_i32 = arith.constant 8 : i32
    %c0_49 = arith.constant 0 : index
    %c0_50 = arith.constant 0 : index
    %209 = vector.load %arg10[%c0_49, %c0_50] : memref<8x128xf32, #tpu.memory_space<vmem>>, vector<8x128xf32>
    tpu.vector_store %arg10[%c0_49, %c0_50], %208 {strides = array<i32>} : memref<8x128xf32, #tpu.memory_space<vmem>>, vector<8x128xf32>,
    %c0_i32_51 = arith.constant 0 : i32
    %210 = arith.cmpi eq, %arg1, %c0_i32_51 : i32
    %211 = arith.extui %210 : i1 to i32
    %c0_i32_52 = arith.constant 0 : i32
    %212 = arith.cmpi ne, %211, %c0_i32_52 : i32
    scf.if %212 {
      %c0_53 = arith.constant 0 : index
      %c0_54 = arith.constant 0 : index
      %213 = vector.load %arg7[%c0_53, %c0_54] : memref<1x128xf32, #tpu.memory_space<vmem>>, vector<1x128xf32>
      %214 = vector.broadcast %213 : vector<1x128xf32> to vector<8x128xf32>
      %215 = arith.mulf %208, %214 : vector<8x128xf32>
      %cst_55 = arith.constant dense<0.000000e+00> : vector<8xf32>
      %216 = vector.multi_reduction <add>, %215, %cst_55 [1] : vector<8x128xf32> to vector<8xf32>
      %217 = vector.shape_cast %216 : vector<8xf32> to vector<8x1xf32>
      %c0_56 = arith.constant 0 : index
      %c0_57 = arith.constant 0 : index
      %218 = memref.load %arg8[%c0_56, %c0_57] : memref<1x1xf32, #tpu.memory_space<smem>>
      %219 = vector.broadcast %218 : f32 to vector<8x1xf32>
      %220 = arith.addf %217, %219 : vector<8x1xf32>
      %221 = arith.negf %220 : vector<8x1xf32>
      %222 = math.exp %221 : vector<8x1xf32>
      %cst_58 = arith.constant 1.000000e+00 : f32
      %223 = vector.broadcast %cst_58 : f32 to vector<8x1xf32>
      %224 = arith.addf %223, %222 : vector<8x1xf32>
      %225 = arith.divf %223, %224 : vector<8x1xf32>
      %c0_59 = arith.constant 0 : index
      %c0_60 = arith.constant 0 : index
      %226 = vector.load %arg9[%c0_59, %c0_60] : memref<8x1xf32, #tpu.memory_space<vmem>>, vector<8x1xf32>
      tpu.vector_store %arg9[%c0_59, %c0_60], %225 {strides = array<i32>} : memref<8x1xf32, #tpu.memory_space<vmem>>, vector<8x1xf32>,
    } else {
    }
    return
  }
  func.func @transform_0(%arg0: i32, %arg1: i32) -> (i32, i32, i32) {
    %c0_i32 = arith.constant 0 : i32
    %c0_i32_0 = arith.constant 0 : i32
    return %arg1, %arg0, %c0_i32 : i32, i32, i32
  }
  func.func @transform_1(%arg0: i32, %arg1: i32) -> (i32, i32) {
    %c0_i32 = arith.constant 0 : i32
    %c0_i32_0 = arith.constant 0 : i32
    %c0_i32_1 = arith.constant 0 : i32
    return %c0_i32, %c0_i32_0 : i32, i32
  }
  func.func @transform_2(%arg0: i32, %arg1: i32) -> (i32, i32) {
    %c0_i32 = arith.constant 0 : i32
    %c0_i32_0 = arith.constant 0 : i32
    %c0_i32_1 = arith.constant 0 : i32
    return %c0_i32, %c0_i32_0 : i32, i32
  }
  func.func @transform_3(%arg0: i32, %arg1: i32) -> (i32, i32) {
    %c0_i32 = arith.constant 0 : i32
    %c0_i32_0 = arith.constant 0 : i32
    %c0_i32_1 = arith.constant 0 : i32
    return %c0_i32, %c0_i32_0 : i32, i32
  }
  func.func @transform_4(%arg0: i32, %arg1: i32) -> (i32, i32) {
    %c0_i32 = arith.constant 0 : i32
    %c0_i32_0 = arith.constant 0 : i32
    %c0_i32_1 = arith.constant 0 : i32
    return %c0_i32, %c0_i32_0 : i32, i32
  }
  func.func @transform_5(%arg0: i32, %arg1: i32) -> (i32, i32) {
    %c0_i32 = arith.constant 0 : i32
    %c0_i32_0 = arith.constant 0 : i32
    %c0_i32_1 = arith.constant 0 : i32
    return %c0_i32, %c0_i32_0 : i32, i32
  }
  func.func @transform_6(%arg0: i32, %arg1: i32) -> (i32, i32) {
    %c0_i32 = arith.constant 0 : i32
    %c0_i32_0 = arith.constant 0 : i32
    %c0_i32_1 = arith.constant 0 : i32
    return %c0_i32, %c0_i32_0 : i32, i32
  }
  func.func @transform_7(%arg0: i32, %arg1: i32) -> (i32, i32) {
    %c0_i32 = arith.constant 0 : i32
    %c0_i32_0 = arith.constant 0 : i32
    return %arg0, %c0_i32 : i32, i32
  }
}

</mosaic_0001>

<bundles_post_ra>
// kernel: gru_win_predictor.1
= control target key start
LH: loop header
LB: loop body
LE: loop exit
PB: predicated region body
PF: predicated region fallthrough
CT: control target
= control target key end

     0   :  { %v2434_v1 = vmov 0   ;;  %vm98_vm0 = vcmask 130048   ;;  %v2436_v16 = vmov 0.0   ;;  %vm1779_vm1 = vmmov 0   ;;  %s2426_s1 = inlined_call_operand.vmem [shape: bf16[16,384], index: 1, kind: input, shape index: {}]   ;;  %s2427_s0 = inlined_call_operand.vmem [shape: bf16[8,8,16], index: 0, kind: input, shape index: {}]   ;;  %s2428_s3 = inlined_call_operand.vmem [shape: bf16[128,384], index: 3, kind: input, shape index: {}]   ;;  %s2429_s2 = inlined_call_operand.vmem [shape: f32[1,384], index: 2, kind: input, shape index: {}]   ;;  %s2430_s4 = inlined_call_operand.vmem [shape: f32[1,128], index: 4, kind: input, shape index: {}]   ;;  %s2431_s5 = inlined_call_operand.vmem [shape: f32[1,128], index: 5, kind: input, shape index: {}]   ;;  %s2432_s6 = inlined_call_operand.<no memory space> [shape: f32[1,1], index: 6, kind: input, shape index: {}]   ;;  %s2433_s7 = inlined_call_operand.vmem [shape: f32[8,1], index: 7, kind: output, shape index: {}]  }
   0x1   :  { %v1634_v0 = vld [vmem:[%s2426_s1 + $0x4] ss:$12 sps:$4 sm:$0xff]   ;;  %143 = vmatprep.mubr.bf16.mxu0 %v2434_v1  ;;  %v1636_v2 = vld [vmem:[%s2426_s1] ss:$12 sps:$4 sm:$0xff]   ;;  %v1844_v6 = vld [vmem:[%s2428_s3 + $0x1c] ss:$12 sps:$4 sm:$0xff]   ;;  %v47_v34 = vlaneseq }
   0x2   :  { %111 = vmatprep.subr.bf16.mxu0 %v1634_v0  ;;  %v1637_v3 = vld [vmem:[%s2427_s0] sm:$0xff]   ;;  %v1644_v9 = vld [vmem:[%s2427_s0 + $0x8] sm:$0xff]   ;;  %v1868_v10 = vld [vmem:[%s2428_s3 + $0x30] ss:$12 sps:$4 sm:$0xff]   ;;  %v1780_v31 = vmov 0.0|0.0   ;;  %vm1319_vm2 = vcmask 7168  }
   0x3   :  { %112 = vmatpush1.bf16.msra.mxu0 %v1636_v2  ;;  %v1834_v4 = vld [vmem:[%s2428_s3 + $0x4] ss:$12 sps:$4 sm:$0xff]   ;;  %v1839_v5 = vld [vmem:[%s2428_s3] ss:$12 sps:$4 sm:$0xff]   ;;  %1462 = vmatprep.mubr.msk.bf16.mxu1 %vm98_vm0, %v1637_v3  ;;  %v1655_v11 = vld [vmem:[%s2426_s1 + $0x8] ss:$12 sps:$4 sm:$0xff]  }
   0x4   :  { %445 = vmatprep.subr.bf16.mxu0 %v1834_v4  ;;  %v1853_v7 = vld [vmem:[%s2428_s3 + $0x18] ss:$12 sps:$4 sm:$0xff]   ;;  %v1860_v8 = vld [vmem:[%s2428_s3 + $0x34] ss:$12 sps:$4 sm:$0xff]   ;;  %1460 = vmatprep.subr.bf16.mxu1 %v1655_v11  ;;  %v1922_v20 = vld [vmem:[%s2428_s3 + $0x7c] ss:$12 sps:$4 sm:$0xff]  }
   0x5   :  { %v1878_v12 = vld [vmem:[%s2428_s3 + $0x4c] ss:$12 sps:$4 sm:$0xff]   ;;  %v1884_v13 = vld [vmem:[%s2428_s3 + $0x48] ss:$12 sps:$4 sm:$0xff]   ;;  %1461 = vmatpush3.bf16.msra.mxu1 %v1655_v11  ;;  %v1894_v15 = vld [vmem:[%s2428_s3 + $0x64] ss:$12 sps:$4 sm:$0xff]  }
   0x6   :  { %1332 = vmatmul.mubr.msk.bf16.vlgmr.msra.gmra.mrb[0].mxu0 %vm98_vm0, %v1637_v3  ;;  %v1651_v14 = vld [vmem:[%s2427_s0 + $0x10] sm:$0xff]   ;;  %1470 = vmatprep.subr.bf16.mxu1 %v2436_v16  ;;  %v1908_v18 = vld [vmem:[%s2428_s3 + $0x20] ss:$12 sps:$4 sm:$0xff]   ;;  %v1927_v21 = vld [vmem:[%s2428_s3 + $0x78] ss:$12 sps:$4 sm:$0xff]   ;;  %v48_v35 = vshrl.u32 %v47_v34, 7 }
   0x7   :  { %446 = vmatpush1.bf16.msra.mxu0 %v1839_v5  ;;  %153 = vmatprep.mubr.bf16.mxu0 %v2434_v1  ;;  %v1901_v17 = vld [vmem:[%s2428_s3 + $0x8] ss:$12 sps:$4 sm:$0xff]   ;;  %v1915_v19 = vld [vmem:[%s2428_s3 + $0x60] ss:$12 sps:$4 sm:$0xff]   ;;  %v1934_v22 = vld [vmem:[%s2428_s3 + $0x38] ss:$12 sps:$4 sm:$0xff]  }
   0x8   :  { %447 = vmatprep.subr.bf16.mxu0 %v1844_v6  ;;  %1463 = vmatmul.mubr.msk.bf16.vlgmr.msra.gmra.mrb[0].mxu1 %vm98_vm0, %v1644_v9  ;;  %v1659_v23 = vld [vmem:[%s2427_s0 + $0x18] sm:$0xff]   ;;  %v1945_v24 = vld [vmem:[%s2428_s3 + $0x94] ss:$12 sps:$4 sm:$0xff]   ;;  %v49_v36 = vsub.s32 0, %v48_v35  ;;  %v53_v38 = vsub.s32 1, %v48_v35  ;;  %v57_v47 = vsub.s32 2, %v48_v35 }
   0x9   :  { %1471 = vmatpush3.bf16.msra.mxu1 %v1901_v17  ;;  %1466 = vmatprep.mubr.msk.bf16.mxu1 %vm98_vm0, %v1651_v14  ;;  %v1953_v25 = vld [vmem:[%s2428_s3 + $0x50] ss:$12 sps:$4 sm:$0xff]   ;;  %v1968_v27 = vld [vmem:[%s2428_s3 + $0xac] ss:$12 sps:$4 sm:$0xff]   ;;  %v1975_v28 = vld [vmem:[%s2428_s3 + $0x68] ss:$12 sps:$4 sm:$0xff]  }
   0xa   :  { %1472 = vmatprep.subr.bf16.mxu1 %v2436_v16  ;;  %v1961_v26 = vld [vmem:[%s2428_s3 + $0x90] ss:$12 sps:$4 sm:$0xff]   ;;  %v1981_v29 = vld [vmem:[%s2428_s3 + $0xa8] ss:$12 sps:$4 sm:$0xff]   ;;  %v1990_v30 = vld [vmem:[%s2428_s3 + $0x80] ss:$12 sps:$4 sm:$0xff]  }
   0xb   :  { %448 = vmatpush1.bf16.msra.mxu0 %v1853_v7  ;;  %v1999_v32 = vld [vmem:[%s2428_s3 + $0x98] ss:$12 sps:$4 sm:$0xff]   ;;  %v2009_v33 = vld [vmem:[%s2428_s3 + $0xb0] ss:$12 sps:$4 sm:$0xff]   ;;  %v45_v37 = vld [vmem:[%s2429_s2] sm:$0x7] }
   0xc   :  { %449 = vmatprep.subr.bf16.mxu0 %v1860_v8  ;;  %v50_v40 = vrot.slane %v45_v37, %v49_v36  ;;  %v54_v42 = vrot.slane %v45_v37, %v53_v38  ;;  %v2053_v49 = vrot.slane %v45_v37, %v57_v47 }
   0xd   :  { %1473 = vmatpush3.bf16.msra.mxu1 %v1908_v18 }
   0xe   :  { %1333 = vmatmul.mubr.msk.bf16.gmra.mrb[4].mxu0 %vm98_vm0, %v1644_v9  ;;  %1474 = vmatprep.subr.bf16.mxu1 %v2436_v16 }
   0xf   :  { %450 = vmatpush1.bf16.msra.mxu0 %v1868_v10  ;;  %163 = vmatprep.mubr.bf16.mxu0 %v2434_v1 }
  0x10   :  { %451 = vmatprep.subr.bf16.mxu0 %v1878_v12  ;;  %1467 = vmatmul.mubr.msk.bf16.gmra.mrb[4].mxu1 %vm98_vm0, %v1659_v23 }
  0x11   :  { %1475 = vmatpush3.bf16.msra.mxu1 %v1934_v22  ;;  %1486 = vmatprep.mubr.msk.bf16.mxu1 %vm1779_vm1, %v2436_v16 }
  0x12   :  { %1476 = vmatprep.subr.bf16.mxu1 %v2436_v16 }
  0x13   :  { %452 = vmatpush1.bf16.msra.mxu0 %v1884_v13 }
  0x14   :  { %453 = vmatprep.subr.bf16.mxu0 %v1894_v15 }
  0x15   :  { %1477 = vmatpush3.bf16.msra.mxu1 %v1953_v25 }
  0x16   :  { %1334 = vmatmul.mubr.msk.bf16.gmra.mrb[8].mxu0 %vm98_vm0, %v1651_v14  ;;  %1478 = vmatprep.subr.bf16.mxu1 %v2436_v16 }
  0x17   :  { %454 = vmatpush1.bf16.msra.mxu0 %v1915_v19  ;;  %173 = vmatprep.mubr.bf16.mxu0 %v2434_v1 }
  0x18   :  { %455 = vmatprep.subr.bf16.mxu0 %v1922_v20 }
  0x19   :  { %1479 = vmatpush3.bf16.msra.mxu1 %v1975_v28 }
  0x1a   :  { %1480 = vmatprep.subr.bf16.mxu1 %v2436_v16 }
  0x1b   :  { %456 = vmatpush1.bf16.msra.mxu0 %v1927_v21 }
  0x1c   :  { %457 = vmatprep.subr.bf16.mxu0 %v1945_v24 }
  0x1d   :  { %1481 = vmatpush3.bf16.msra.mxu1 %v1990_v30 }
  0x1e   :  { %1335 = vmatmul.mubr.msk.bf16.gmra.mrb[12].mxu0 %vm98_vm0, %v1659_v23  ;;  %1482 = vmatprep.subr.bf16.mxu1 %v2436_v16 }
  0x1f   :  { %458 = vmatpush1.bf16.msra.mxu0 %v1961_v26  ;;  %477 = vmatprep.mubr.bf16.mxu0 %v2434_v1 }
  0x20   :  { %459 = vmatprep.subr.bf16.mxu0 %v1968_v27 }
  0x21   :  { %1483 = vmatpush3.bf16.msra.mxu1 %v1999_v32 }
  0x22   :  { %1484 = vmatprep.subr.bf16.mxu1 %v2436_v16 }
  0x23   :  { %460 = vmatpush1.bf16.msra.mxu0 %v1981_v29 }
  0x24   :  { %552 = vmatprep.subr.bf16.mxu0 %v1834_v4 }
  0x25   :  { %1485 = vmatpush3.bf16.msra.mxu1 %v2009_v33 }
  0x26   :  { %478 = vmatmul.mubr.bf16.vlgmr.msra.gmra.mrb[16].mxu0 %v1780_v31  ;;  %1490 = vmatprep.subr.bf16.mxu1 %v2436_v16 }
  0x27   :  { %553 = vmatpush1.bf16.msra.mxu0 %v1839_v5  ;;  %584 = vmatprep.mubr.bf16.mxu0 %v2434_v1 }
  0x28   :  { %554 = vmatprep.subr.bf16.mxu0 %v1844_v6  ;;  %1487 = vmatmul.mubr.bf16.vlgmr.msra.gmra.mrb[8].mxu1 %v1780_v31 }
  0x29   :  { %1491 = vmatpush3.bf16.msra.mxu1 %v1901_v17  ;;  %1506 = vmatprep.mubr.msk.bf16.mxu1 %vm1779_vm1, %v2436_v16 }
  0x2a   :  { %1492 = vmatprep.subr.bf16.mxu1 %v2436_v16 }
  0x2b   :  { %555 = vmatpush1.bf16.msra.mxu0 %v1853_v7 }
  0x2c   :  { %556 = vmatprep.subr.bf16.mxu0 %v1860_v8 }
  0x2d   :  { %1493 = vmatpush3.bf16.msra.mxu1 %v1908_v18 }
  0x2e   :  { %1494 = vmatprep.subr.bf16.mxu1 %v2436_v16 }
  0x2f   :  { %557 = vmatpush1.bf16.msra.mxu0 %v1868_v10 }
  0x30   :  { %558 = vmatprep.subr.bf16.mxu0 %v1878_v12 }
  0x31   :  { %1495 = vmatpush3.bf16.msra.mxu1 %v1934_v22 }
  0x32   :  { %1496 = vmatprep.subr.bf16.mxu1 %v2436_v16 }
  0x33   :  { %559 = vmatpush1.bf16.msra.mxu0 %v1884_v13 }
  0x34   :  { %560 = vmatprep.subr.bf16.mxu0 %v1894_v15 }
  0x35   :  { %1497 = vmatpush3.bf16.msra.mxu1 %v1953_v25 }
  0x36   :  { %1498 = vmatprep.subr.bf16.mxu1 %v2436_v16 }
  0x37   :  { %561 = vmatpush1.bf16.msra.mxu0 %v1915_v19 }
  0x38   :  { %562 = vmatprep.subr.bf16.mxu0 %v1922_v20 }
  0x39   :  { %1499 = vmatpush3.bf16.msra.mxu1 %v1975_v28 }
  0x3a   :  { %1500 = vmatprep.subr.bf16.mxu1 %v2436_v16 }
  0x3b   :  { %563 = vmatpush1.bf16.msra.mxu0 %v1927_v21 }
  0x3c   :  { %564 = vmatprep.subr.bf16.mxu0 %v1945_v24 }
  0x3d   :  { %1501 = vmatpush3.bf16.msra.mxu1 %v1990_v30 }
  0x3e   :  { %1502 = vmatprep.subr.bf16.mxu1 %v2436_v16 }
  0x3f   :  { %565 = vmatpush1.bf16.msra.mxu0 %v1961_v26 }
  0x40   :  { %566 = vmatprep.subr.bf16.mxu0 %v1968_v27 }
  0x41   :  { %1503 = vmatpush3.bf16.msra.mxu1 %v1999_v32 }
  0x42   :  { %1504 = vmatprep.subr.bf16.mxu1 %v2436_v16 }
  0x43   :  { %567 = vmatpush1.bf16.msra.mxu0 %v1981_v29 }
  0x44   :  { %659 = vmatprep.subr.bf16.mxu0 %v1834_v4 }
  0x45   :  { %1505 = vmatpush3.bf16.msra.mxu1 %v2009_v33 }
  0x46   :  { %1510 = vmatprep.subr.bf16.mxu1 %v2436_v16 }
  0xd9   :  { %v145_v39 = vpop.f32.mrb[0].mxu0 }
  0xda   :  { %v147_v41 = vpop.f32.mrb[1].mxu0 }
  0xdb   :  { %v149_v43 = vpop.f32.mrb[2].mxu0  ;;  %v1464_v56 = vpop.f32.mrb[0].mxu1 }
  0xdc   :  { %v2049_v44 = vadd.f32 %v149_v43, %v50_v40  ;;  %v151_v45 = vpop.f32.mrb[3].mxu0  ;;  %v2064_v58 = vadd.f32 %v1464_v56, %v2053_v49  ;;  %v218_v59 = vpop.f32.mrb[1].mxu1 }
  0xdd   :  { %v2051_v46 = vadd.f32 %v151_v45, %v54_v42  ;;  %v1465_v60 = vpop.f32.mrb[2].mxu1 }
  0xde   :  { %v2067_v61 = vadd.f32 %v1465_v60, %v2053_v49  ;;  %v221_v62 = vpop.f32.mrb[3].mxu1 }
  0xdf   :  { %v2070_v63 = vadd.f32 %v221_v62, %v2053_v49 }
  0xe1   :  { %v155_v48 = vpop.f32.mrb[4].mxu0 }
  0xe2   :  { %v2055_v50 = vadd.f32 %v155_v48, %v50_v40  ;;  %v157_v51 = vpop.f32.mrb[5].mxu0 }
  0xe3   :  { %v2057_v52 = vadd.f32 %v157_v51, %v54_v42  ;;  %v159_v53 = vpop.f32.mrb[6].mxu0  ;;  %v1468_v31 = vpop.f32.mrb[4].mxu1 }
  0xe4   :  { %v2059_v54 = vadd.f32 %v159_v53, %v50_v40  ;;  %v161_v55 = vpop.f32.mrb[7].mxu0  ;;  %v2081_v35 = vadd.f32 %v1468_v31, %v2053_v49  ;;  %v234_v36 = vpop.f32.mrb[5].mxu1 }
  0xe5   :  { %v2061_v57 = vadd.f32 %v161_v55, %v54_v42  ;;  %v2084_v37 = vadd.f32 %v234_v36, %v2053_v49  ;;  %v1469_v38 = vpop.f32.mrb[6].mxu1 }
  0xe6   :  { %2438 = vst [vmem:[#allocation5_spill] sm:$0xff] %v2081_v35  ;;  %v2087_v43 = vadd.f32 %v1469_v38, %v2053_v49  ;;  %v237_v45 = vpop.f32.mrb[7].mxu1 }
  0xe7   :  { %v2090_v47 = vadd.f32 %v237_v45, %v2053_v49 }
  0xe8   :  { %2439 = vst [vmem:[#allocation6_spill] sm:$0xff] %v2087_v43 }
  0xe9   :  { %v165_v0 = vpop.f32.mrb[8].mxu0 }
  0xea   :  { %v2072_v2 = vadd.f32 %v165_v0, %v50_v40  ;;  %v167_v3 = vpop.f32.mrb[9].mxu0 }
  0xeb   :  { %v2074_v9 = vadd.f32 %v167_v3, %v54_v42  ;;  %v169_v11 = vpop.f32.mrb[10].mxu0  ;;  %v146_v3 = vadd.f32 %v145_v39, %v50_v40  ;;  %v2103_v39 = vld [vmem:[%s2430_s4] ss:$0 sm:$0xff] }
  0xec   :  { %v2076_v14 = vadd.f32 %v169_v11, %v50_v40  ;;  %v171_v23 = vpop.f32.mrb[11].mxu0  ;;  %v148_v11 = vadd.f32 %v147_v41, %v54_v42 }
  0xed   :  { %v2078_v34 = vadd.f32 %v171_v23, %v54_v42 }
  0xf1   :  { %v175_v48 = vpop.f32.mrb[12].mxu0 }
  0xf2   :  { %v2092_v51 = vadd.f32 %v175_v48, %v50_v40  ;;  %v177_v53 = vpop.f32.mrb[13].mxu0 }
  0xf3   :  { %v2094_v55 = vadd.f32 %v177_v53, %v54_v42  ;;  %v179_v56 = vpop.f32.mrb[14].mxu0 }
  0xf4   :  { %v2096_v60 = vadd.f32 %v179_v56, %v50_v40  ;;  %v181_v62 = vpop.f32.mrb[15].mxu0 }
  0xf5   :  { %2440 = vst [vmem:[#allocation7_spill] sm:$0xff] %v2094_v55  ;;  %v2098_v0 = vadd.f32 %v181_v62, %v54_v42 }
  0xf6   :  { %2441 = vst [vmem:[#allocation8_spill] sm:$0xff] %v2096_v60 }
  0xf9   :  { %v479_v23 = vpop.f32.mrb[16].mxu0 }
  0xfa   :  { %v526_v31 = vadd.f32 %v479_v23, %v146_v3  ;;  %v481_v36 = vpop.f32.mrb[17].mxu0 }
  0xfb   :  { %v527_v38 = vadd.f32 %v481_v36, %v148_v11  ;;  %v483_v45 = vpop.f32.mrb[18].mxu0  ;;  %v520_v48 = vpop.f32.mrb[8].mxu1 }
  0xfc   :  { %v1365_v1 = vmul.f32 -1.442695, %v526_v31  ;;  %v484_v16 = vpop.f32.mrb[19].mxu0  ;;  %v1488_v43 = vpop.f32.mrb[9].mxu1  ;;  %v540_v40 = vadd.f32 %v2103_v39, %v520_v48 }
  0xfd   :  { %v1366_v53 = vmul.f32 -1.442695, %v527_v38  ;;  %v523_v35 = vpop.f32.mrb[10].mxu1 }
  0xfe   :  { %1674 = vpow2.f32 %v1365_v1  ;;  %v1489_v55 = vpop.f32.mrb[11].mxu1  ;;  %v219_v1 = vadd.f32 %v218_v59, %v2053_v49  ;;  %v2442_v49 = vmov 0.0   ;;  %v2443_v59 = vmov 0  }
  0xff   :  { %1676 = vpow2.f32 %v1366_v53 }
 0x108   :  { %v1675_v56 = vpop.eup %1674 }
 0x109   :  { %v534_v60 = vadd.f32 1.0, %v1675_v56  ;;  %v1677_v41 = vpop.eup %1676 }
 0x10a   :  { %v535_v43 = vadd.f32 1.0, %v1677_v41 }
 0x10b   :  { %1678 = vrcp.f32 %v534_v60 }
 0x115   :  { %v1679_v42 = vpop.eup %1678 }
 0x116   :  { %v541_v16 = vmul.f32 %v1679_v42, %v540_v40 }
 0x118   :  { %v542_v62 = vadd.f32 %v541_v16, %v219_v1 }
 0x11a   :  { %1680 = vtanh.f32 %v542_v62 }
 0x11b   :  { %1682 = vrcp.f32 %v535_v43 }
 0x124   :  { %v1681_v35 = vpop.eup %1680 }
 0x125   :  { %v544_v55 = vsub.f32 0.0, %v1681_v35  ;;  %v1683_v3 = vpop.eup %1682 }
 0x127   :  { %v545_v60 = vmul.f32 %v1683_v3, %v544_v55 }
 0x129   :  { %v2107_v11 = vadd.f32 %v1681_v35, %v545_v60 }
 0x12b   :  { %v551_v23 = vpack.c.bf16 %v2107_v11, %v2107_v11 }
 0x12d   :  { %585 = vmatmul.mubr.bf16.vlgmr.msra.gmra.mrb[20].mxu0 %v551_v23  ;;  %1507 = vmatmul.mubr.bf16.vlgmr.msra.gmra.mrb[12].mxu1 %v551_v23 }
 0x12e   :  { %660 = vmatpush1.bf16.msra.mxu0 %v1839_v5  ;;  %1511 = vmatpush3.bf16.msra.mxu1 %v1901_v17 }
 0x12f   :  { %661 = vmatprep.subr.bf16.mxu0 %v1844_v6  ;;  %1512 = vmatprep.subr.bf16.mxu1 %v2442_v49 }
 0x130   :  { %691 = vmatprep.mubr.bf16.mxu0 %v2443_v59  ;;  %1526 = vmatprep.mubr.msk.bf16.mxu1 %vm1779_vm1, %v2442_v49 }
 0x132   :  { %662 = vmatpush1.bf16.msra.mxu0 %v1853_v7  ;;  %1513 = vmatpush3.bf16.msra.mxu1 %v1908_v18 }
 0x133   :  { %663 = vmatprep.subr.bf16.mxu0 %v1860_v8  ;;  %1514 = vmatprep.subr.bf16.mxu1 %v2442_v49 }
 0x136   :  { %664 = vmatpush1.bf16.msra.mxu0 %v1868_v10  ;;  %1515 = vmatpush3.bf16.msra.mxu1 %v1934_v22 }
 0x137   :  { %665 = vmatprep.subr.bf16.mxu0 %v1878_v12  ;;  %1516 = vmatprep.subr.bf16.mxu1 %v2442_v49 }
 0x13a   :  { %666 = vmatpush1.bf16.msra.mxu0 %v1884_v13  ;;  %1517 = vmatpush3.bf16.msra.mxu1 %v1953_v25 }
 0x13b   :  { %667 = vmatprep.subr.bf16.mxu0 %v1894_v15  ;;  %1518 = vmatprep.subr.bf16.mxu1 %v2442_v49 }
 0x13e   :  { %668 = vmatpush1.bf16.msra.mxu0 %v1915_v19  ;;  %1519 = vmatpush3.bf16.msra.mxu1 %v1975_v28 }
 0x13f   :  { %669 = vmatprep.subr.bf16.mxu0 %v1922_v20  ;;  %1520 = vmatprep.subr.bf16.mxu1 %v2442_v49 }
 0x142   :  { %670 = vmatpush1.bf16.msra.mxu0 %v1927_v21  ;;  %1521 = vmatpush3.bf16.msra.mxu1 %v1990_v30 }
 0x143   :  { %671 = vmatprep.subr.bf16.mxu0 %v1945_v24  ;;  %1522 = vmatprep.subr.bf16.mxu1 %v2442_v49 }
 0x146   :  { %672 = vmatpush1.bf16.msra.mxu0 %v1961_v26  ;;  %1523 = vmatpush3.bf16.msra.mxu1 %v1999_v32 }
 0x147   :  { %673 = vmatprep.subr.bf16.mxu0 %v1968_v27  ;;  %1524 = vmatprep.subr.bf16.mxu1 %v2442_v49 }
 0x14a   :  { %674 = vmatpush1.bf16.msra.mxu0 %v1981_v29  ;;  %1525 = vmatpush3.bf16.msra.mxu1 %v2009_v33 }
 0x14b   :  { %766 = vmatprep.subr.bf16.mxu0 %v1834_v4  ;;  %1530 = vmatprep.subr.bf16.mxu1 %v2442_v49 }
 0x200   :  { %v586_v31 = vpop.f32.mrb[20].mxu0  ;;  %v627_v36 = vpop.f32.mrb[12].mxu1 }
 0x201   :  { %v633_v38 = vadd.f32 %v586_v31, %v2049_v44  ;;  %v588_v45 = vpop.f32.mrb[21].mxu0  ;;  %v1508_v48 = vpop.f32.mrb[13].mxu1  ;;  %v647_v55 = vadd.f32 %v2103_v39, %v627_v36 }
 0x202   :  { %v634_v53 = vadd.f32 %v588_v45, %v2051_v46  ;;  %v590_v56 = vpop.f32.mrb[22].mxu0  ;;  %v630_v40 = vpop.f32.mrb[14].mxu1 }
 0x203   :  { %v1367_v41 = vmul.f32 -1.442695, %v633_v38  ;;  %v591_v42 = vpop.f32.mrb[23].mxu0  ;;  %v1509_v1 = vpop.f32.mrb[15].mxu1 }
 0x204   :  { %v1368_v16 = vmul.f32 -1.442695, %v634_v53 }
 0x205   :  { %1684 = vpow2.f32 %v1367_v41 }
 0x206   :  { %1686 = vpow2.f32 %v1368_v16 }
 0x20f   :  { %v1685_v43 = vpop.eup %1684 }
 0x210   :  { %v641_v62 = vadd.f32 1.0, %v1685_v43  ;;  %v1687_v35 = vpop.eup %1686 }
 0x211   :  { %v642_v23 = vadd.f32 1.0, %v1687_v35 }
 0x212   :  { %1688 = vrcp.f32 %v641_v62 }
 0x21c   :  { %v1689_v3 = vpop.eup %1688 }
 0x21d   :  { %v648_v44 = vmul.f32 %v1689_v3, %v647_v55 }
 0x21f   :  { %v649_v60 = vadd.f32 %v648_v44, %v2070_v63 }
 0x221   :  { %1690 = vtanh.f32 %v649_v60 }
 0x222   :  { %1692 = vrcp.f32 %v642_v23 }
 0x22b   :  { %v1691_v46 = vpop.eup %1690 }
 0x22c   :  { %v651_v31 = vsub.f32 %v2107_v11, %v1691_v46  ;;  %v1693_v38 = vpop.eup %1692 }
 0x22e   :  { %v652_v45 = vmul.f32 %v1693_v38, %v651_v31 }
 0x230   :  { %v2151_v48 = vadd.f32 %v1691_v46, %v652_v45 }
 0x232   :  { %v658_v53 = vpack.c.bf16 %v2151_v48, %v2151_v48 }
 0x234   :  { %692 = vmatmul.mubr.bf16.vlgmr.msra.gmra.mrb[24].mxu0 %v658_v53  ;;  %1527 = vmatmul.mubr.bf16.vlgmr.msra.gmra.mrb[16].mxu1 %v658_v53 }
 0x235   :  { %767 = vmatpush1.bf16.msra.mxu0 %v1839_v5  ;;  %1531 = vmatpush3.bf16.msra.mxu1 %v1901_v17 }
 0x236   :  { %768 = vmatprep.subr.bf16.mxu0 %v1844_v6  ;;  %1532 = vmatprep.subr.bf16.mxu1 %v2442_v49 }
 0x237   :  { %798 = vmatprep.mubr.bf16.mxu0 %v2443_v59  ;;  %1546 = vmatprep.mubr.msk.bf16.mxu1 %vm1779_vm1, %v2442_v49 }
 0x239   :  { %769 = vmatpush1.bf16.msra.mxu0 %v1853_v7  ;;  %1533 = vmatpush3.bf16.msra.mxu1 %v1908_v18 }
 0x23a   :  { %770 = vmatprep.subr.bf16.mxu0 %v1860_v8  ;;  %1534 = vmatprep.subr.bf16.mxu1 %v2442_v49 }
 0x23d   :  { %771 = vmatpush1.bf16.msra.mxu0 %v1868_v10  ;;  %1535 = vmatpush3.bf16.msra.mxu1 %v1934_v22 }
 0x23e   :  { %772 = vmatprep.subr.bf16.mxu0 %v1878_v12  ;;  %1536 = vmatprep.subr.bf16.mxu1 %v2442_v49 }
 0x241   :  { %773 = vmatpush1.bf16.msra.mxu0 %v1884_v13  ;;  %1537 = vmatpush3.bf16.msra.mxu1 %v1953_v25 }
 0x242   :  { %774 = vmatprep.subr.bf16.mxu0 %v1894_v15  ;;  %1538 = vmatprep.subr.bf16.mxu1 %v2442_v49 }
 0x245   :  { %775 = vmatpush1.bf16.msra.mxu0 %v1915_v19  ;;  %1539 = vmatpush3.bf16.msra.mxu1 %v1975_v28 }
 0x246   :  { %776 = vmatprep.subr.bf16.mxu0 %v1922_v20  ;;  %1540 = vmatprep.subr.bf16.mxu1 %v2442_v49 }
 0x249   :  { %777 = vmatpush1.bf16.msra.mxu0 %v1927_v21  ;;  %1541 = vmatpush3.bf16.msra.mxu1 %v1990_v30 }
 0x24a   :  { %778 = vmatprep.subr.bf16.mxu0 %v1945_v24  ;;  %1542 = vmatprep.subr.bf16.mxu1 %v2442_v49 }
 0x24d   :  { %779 = vmatpush1.bf16.msra.mxu0 %v1961_v26  ;;  %1543 = vmatpush3.bf16.msra.mxu1 %v1999_v32 }
 0x24e   :  { %780 = vmatprep.subr.bf16.mxu0 %v1968_v27  ;;  %1544 = vmatprep.subr.bf16.mxu1 %v2442_v49 }
 0x251   :  { %781 = vmatpush1.bf16.msra.mxu0 %v1981_v29  ;;  %1545 = vmatpush3.bf16.msra.mxu1 %v2009_v33 }
 0x252   :  { %873 = vmatprep.subr.bf16.mxu0 %v1834_v4  ;;  %1550 = vmatprep.subr.bf16.mxu1 %v2442_v49 }
 0x307   :  { %v693_v63 = vpop.f32.mrb[24].mxu0  ;;  %v734_v11 = vpop.f32.mrb[16].mxu1 }
 0x308   :  { %v740_v36 = vadd.f32 %v693_v63, %v2055_v50  ;;  %v695_v56 = vpop.f32.mrb[25].mxu0  ;;  %v1528_v40 = vpop.f32.mrb[17].mxu1  ;;  %v754_v60 = vadd.f32 %v2103_v39, %v734_v11 }
 0x309   :  { %v741_v41 = vadd.f32 %v695_v56, %v2057_v52  ;;  %v697_v42 = vpop.f32.mrb[26].mxu0  ;;  %v737_v1 = vpop.f32.mrb[18].mxu1 }
 0x30a   :  { %v1369_v16 = vmul.f32 -1.442695, %v740_v36  ;;  %v698_v43 = vpop.f32.mrb[27].mxu0  ;;  %v1529_v62 = vpop.f32.mrb[19].mxu1 }
 0x30b   :  { %v1370_v35 = vmul.f32 -1.442695, %v741_v41 }
 0x30c   :  { %1694 = vpow2.f32 %v1369_v16 }
 0x30d   :  { %1696 = vpow2.f32 %v1370_v35 }
 0x316   :  { %v1695_v55 = vpop.eup %1694 }
 0x317   :  { %v748_v3 = vadd.f32 1.0, %v1695_v55  ;;  %v1697_v44 = vpop.eup %1696 }
 0x318   :  { %v749_v31 = vadd.f32 1.0, %v1697_v44 }
 0x319   :  { %1698 = vrcp.f32 %v748_v3 }
 0x323   :  { %v1699_v23 = vpop.eup %1698 }
 0x324   :  { %v755_v50 = vmul.f32 %v1699_v23, %v754_v60 }
 0x326   :  { %v756_v46 = vadd.f32 %v755_v50, %v2064_v58 }
 0x328   :  { %1700 = vtanh.f32 %v756_v46 }
 0x329   :  { %1702 = vrcp.f32 %v749_v31 }
 0x332   :  { %v1701_v52 = vpop.eup %1700 }
 0x333   :  { %v758_v38 = vsub.f32 %v2151_v48, %v1701_v52  ;;  %v1703_v45 = vpop.eup %1702 }
 0x335   :  { %v759_v53 = vmul.f32 %v1703_v45, %v758_v38 }
 0x337   :  { %v2195_v63 = vadd.f32 %v1701_v52, %v759_v53 }
 0x339   :  { %v765_v36 = vpack.c.bf16 %v2195_v63, %v2195_v63 }
 0x33b   :  { %799 = vmatmul.mubr.bf16.vlgmr.msra.gmra.mrb[28].mxu0 %v765_v36  ;;  %1547 = vmatmul.mubr.bf16.vlgmr.msra.gmra.mrb[20].mxu1 %v765_v36 }
 0x33c   :  { %874 = vmatpush1.bf16.msra.mxu0 %v1839_v5  ;;  %1551 = vmatpush3.bf16.msra.mxu1 %v1901_v17 }
 0x33d   :  { %875 = vmatprep.subr.bf16.mxu0 %v1844_v6  ;;  %1552 = vmatprep.subr.bf16.mxu1 %v2442_v49 }
 0x33e   :  { %905 = vmatprep.mubr.bf16.mxu0 %v2443_v59  ;;  %1566 = vmatprep.mubr.msk.bf16.mxu1 %vm1779_vm1, %v2442_v49 }
 0x340   :  { %876 = vmatpush1.bf16.msra.mxu0 %v1853_v7  ;;  %1553 = vmatpush3.bf16.msra.mxu1 %v1908_v18 }
 0x341   :  { %877 = vmatprep.subr.bf16.mxu0 %v1860_v8  ;;  %1554 = vmatprep.subr.bf16.mxu1 %v2442_v49 }
 0x344   :  { %878 = vmatpush1.bf16.msra.mxu0 %v1868_v10  ;;  %1555 = vmatpush3.bf16.msra.mxu1 %v1934_v22 }
 0x345   :  { %879 = vmatprep.subr.bf16.mxu0 %v1878_v12  ;;  %1556 = vmatprep.subr.bf16.mxu1 %v2442_v49 }
 0x348   :  { %880 = vmatpush1.bf16.msra.mxu0 %v1884_v13  ;;  %1557 = vmatpush3.bf16.msra.mxu1 %v1953_v25 }
 0x349   :  { %881 = vmatprep.subr.bf16.mxu0 %v1894_v15  ;;  %1558 = vmatprep.subr.bf16.mxu1 %v2442_v49 }
 0x34c   :  { %882 = vmatpush1.bf16.msra.mxu0 %v1915_v19  ;;  %1559 = vmatpush3.bf16.msra.mxu1 %v1975_v28 }
 0x34d   :  { %883 = vmatprep.subr.bf16.mxu0 %v1922_v20  ;;  %1560 = vmatprep.subr.bf16.mxu1 %v2442_v49 }
 0x350   :  { %884 = vmatpush1.bf16.msra.mxu0 %v1927_v21  ;;  %1561 = vmatpush3.bf16.msra.mxu1 %v1990_v30 }
 0x351   :  { %885 = vmatprep.subr.bf16.mxu0 %v1945_v24  ;;  %1562 = vmatprep.subr.bf16.mxu1 %v2442_v49 }
 0x354   :  { %886 = vmatpush1.bf16.msra.mxu0 %v1961_v26  ;;  %1563 = vmatpush3.bf16.msra.mxu1 %v1999_v32 }
 0x355   :  { %887 = vmatprep.subr.bf16.mxu0 %v1968_v27  ;;  %1564 = vmatprep.subr.bf16.mxu1 %v2442_v49 }
 0x358   :  { %888 = vmatpush1.bf16.msra.mxu0 %v1981_v29  ;;  %1565 = vmatpush3.bf16.msra.mxu1 %v2009_v33 }
 0x359   :  { %980 = vmatprep.subr.bf16.mxu0 %v1834_v4  ;;  %1570 = vmatprep.subr.bf16.mxu1 %v2442_v49 }
 0x40e   :  { %v800_v58 = vpop.f32.mrb[28].mxu0  ;;  %v841_v48 = vpop.f32.mrb[20].mxu1 }
 0x40f   :  { %v847_v11 = vadd.f32 %v800_v58, %v2059_v54  ;;  %v802_v56 = vpop.f32.mrb[29].mxu0  ;;  %v1548_v40 = vpop.f32.mrb[21].mxu1  ;;  %v861_v60 = vadd.f32 %v2103_v39, %v841_v48 }
 0x410   :  { %v848_v41 = vadd.f32 %v802_v56, %v2061_v57  ;;  %v804_v42 = vpop.f32.mrb[30].mxu0  ;;  %v844_v1 = vpop.f32.mrb[22].mxu1 }
 0x411   :  { %v1371_v16 = vmul.f32 -1.442695, %v847_v11  ;;  %v805_v43 = vpop.f32.mrb[31].mxu0  ;;  %v1549_v62 = vpop.f32.mrb[23].mxu1 }
 0x412   :  { %v1372_v35 = vmul.f32 -1.442695, %v848_v41 }
 0x413   :  { %1704 = vpow2.f32 %v1371_v16 }
 0x414   :  { %1706 = vpow2.f32 %v1372_v35 }
 0x41d   :  { %v1705_v55 = vpop.eup %1704 }
 0x41e   :  { %v855_v3 = vadd.f32 1.0, %v1705_v55  ;;  %v1707_v44 = vpop.eup %1706 }
 0x41f   :  { %v856_v46 = vadd.f32 1.0, %v1707_v44 }
 0x420   :  { %1708 = vrcp.f32 %v855_v3 }
 0x42a   :  { %v1709_v23 = vpop.eup %1708 }
 0x42b   :  { %v862_v54 = vmul.f32 %v1709_v23, %v861_v60 }
 0x42d   :  { %v863_v50 = vadd.f32 %v862_v54, %v2067_v61 }
 0x42f   :  { %1710 = vtanh.f32 %v863_v50  ;;  %v2290_v50 = vld [vmem:[%s2428_s3] ss:$12 sps:$4 sm:$0xff]  }
 0x430   :  { %1712 = vrcp.f32 %v856_v46 }
 0x439   :  { %v1711_v57 = vpop.eup %1710 }
 0x43a   :  { %v865_v31 = vsub.f32 %v2195_v63, %v1711_v57  ;;  %v1713_v52 = vpop.eup %1712 }
 0x43c   :  { %v866_v38 = vmul.f32 %v1713_v52, %v865_v31 }
 0x43e   :  { %v2239_v45 = vadd.f32 %v1711_v57, %v866_v38 }
 0x440   :  { %v872_v53 = vpack.c.bf16 %v2239_v45, %v2239_v45 }
 0x442   :  { %906 = vmatmul.mubr.bf16.vlgmr.msra.gmra.mrb[32].mxu0 %v872_v53  ;;  %1567 = vmatmul.mubr.bf16.vlgmr.msra.gmra.mrb[24].mxu1 %v872_v53 }
 0x443   :  { %981 = vmatpush1.bf16.msra.mxu0 %v1839_v5  ;;  %1571 = vmatpush3.bf16.msra.mxu1 %v1901_v17 }
 0x444   :  { %982 = vmatprep.subr.bf16.mxu0 %v1844_v6  ;;  %1572 = vmatprep.subr.bf16.mxu1 %v2442_v49 }
 0x445   :  { %1012 = vmatprep.mubr.bf16.mxu0 %v2443_v59  ;;  %1586 = vmatprep.mubr.msk.bf16.mxu1 %vm1779_vm1, %v2442_v49 }
 0x447   :  { %983 = vmatpush1.bf16.msra.mxu0 %v1853_v7  ;;  %1573 = vmatpush3.bf16.msra.mxu1 %v1908_v18 }
 0x448   :  { %984 = vmatprep.subr.bf16.mxu0 %v1860_v8  ;;  %1574 = vmatprep.subr.bf16.mxu1 %v2442_v49 }
 0x44b   :  { %985 = vmatpush1.bf16.msra.mxu0 %v1868_v10  ;;  %1575 = vmatpush3.bf16.msra.mxu1 %v1934_v22 }
 0x44c   :  { %986 = vmatprep.subr.bf16.mxu0 %v1878_v12  ;;  %1576 = vmatprep.subr.bf16.mxu1 %v2442_v49 }
 0x44f   :  { %987 = vmatpush1.bf16.msra.mxu0 %v1884_v13  ;;  %1577 = vmatpush3.bf16.msra.mxu1 %v1953_v25 }
 0x450   :  { %988 = vmatprep.subr.bf16.mxu0 %v1894_v15  ;;  %1578 = vmatprep.subr.bf16.mxu1 %v2442_v49 }
 0x453   :  { %989 = vmatpush1.bf16.msra.mxu0 %v1915_v19  ;;  %1579 = vmatpush3.bf16.msra.mxu1 %v1975_v28 }
 0x454   :  { %990 = vmatprep.subr.bf16.mxu0 %v1922_v20  ;;  %1580 = vmatprep.subr.bf16.mxu1 %v2442_v49 }
 0x457   :  { %991 = vmatpush1.bf16.msra.mxu0 %v1927_v21  ;;  %1581 = vmatpush3.bf16.msra.mxu1 %v1990_v30 }
 0x458   :  { %992 = vmatprep.subr.bf16.mxu0 %v1945_v24  ;;  %1582 = vmatprep.subr.bf16.mxu1 %v2442_v49 }
 0x45b   :  { %993 = vmatpush1.bf16.msra.mxu0 %v1961_v26  ;;  %1583 = vmatpush3.bf16.msra.mxu1 %v1999_v32 }
 0x45c   :  { %994 = vmatprep.subr.bf16.mxu0 %v1968_v27  ;;  %1584 = vmatprep.subr.bf16.mxu1 %v2442_v49 }
 0x45f   :  { %995 = vmatpush1.bf16.msra.mxu0 %v1981_v29  ;;  %1585 = vmatpush3.bf16.msra.mxu1 %v2009_v33 }
 0x460   :  { %1087 = vmatprep.subr.bf16.mxu0 %v1834_v4  ;;  %1590 = vmatprep.subr.bf16.mxu1 %v2442_v49 }
 0x515   :  { %v907_v5 = vpop.f32.mrb[32].mxu0  ;;  %v948_v6 = vpop.f32.mrb[24].mxu1 }
 0x516   :  { %v954_v61 = vadd.f32 %v907_v5, %v2072_v2  ;;  %v909_v63 = vpop.f32.mrb[33].mxu0  ;;  %v1568_v36 = vpop.f32.mrb[25].mxu1  ;;  %v968_v43 = vadd.f32 %v2103_v39, %v948_v6 }
 0x517   :  { %v955_v58 = vadd.f32 %v909_v63, %v2074_v9  ;;  %v911_v48 = vpop.f32.mrb[34].mxu0  ;;  %v951_v11 = vpop.f32.mrb[26].mxu1  ;;  %v1763_v63 = vld [vmem:[%s2428_s3 + $0x20] ss:$12 sps:$4 sm:$0xff]  }
 0x518   :  { %v1373_v56 = vmul.f32 -1.442695, %v954_v61  ;;  %v912_v40 = vpop.f32.mrb[35].mxu0  ;;  %v1569_v41 = vpop.f32.mrb[27].mxu1  ;;  %v1762_v61 = vld [vmem:[%s2428_s3 + $0x18] ss:$12 sps:$4 sm:$0xff]  }
 0x519   :  { %v1374_v42 = vmul.f32 -1.442695, %v955_v58  ;;  %v1764_v36 = vld [vmem:[%s2428_s3 + $0x34] ss:$12 sps:$4 sm:$0xff]   ;;  %v1766_v58 = vld [vmem:[%s2428_s3 + $0x38] ss:$12 sps:$4 sm:$0xff]  }
 0x51a   :  { %1714 = vpow2.f32 %v1373_v56  ;;  %v1767_v48 = vld [vmem:[%s2428_s3 + $0x4c] ss:$12 sps:$4 sm:$0xff]   ;;  %v1768_v11 = vld [vmem:[%s2428_s3 + $0x48] ss:$12 sps:$4 sm:$0xff]   ;;  %v1769_v56 = vld [vmem:[%s2428_s3 + $0x64] ss:$12 sps:$4 sm:$0xff]  }
 0x51b   :  { %1716 = vpow2.f32 %v1374_v42  ;;  %v1770_v40 = vld [vmem:[%s2428_s3 + $0x60] ss:$12 sps:$4 sm:$0xff]   ;;  %v1771_v41 = vld [vmem:[%s2428_s3 + $0x7c] ss:$12 sps:$4 sm:$0xff]  }
 0x51c   :  { %v1773_v42 = vld [vmem:[%s2428_s3 + $0x94] ss:$12 sps:$4 sm:$0xff]  }
 0x524   :  { %v1715_v1 = vpop.eup %1714 }
 0x525   :  { %v962_v16 = vadd.f32 1.0, %v1715_v1  ;;  %v1717_v4 = vpop.eup %1716  ;;  %v1775_v1 = vld [vmem:[%s2428_s3 + $0xac] ss:$12 sps:$4 sm:$0xff]  }
 0x526   :  { %v963_v55 = vadd.f32 1.0, %v1717_v4 }
 0x527   :  { %1718 = vrcp.f32 %v962_v16 }
 0x531   :  { %v1719_v62 = vpop.eup %1718 }
 0x532   :  { %v969_v2 = vmul.f32 %v1719_v62, %v968_v43 }
 0x534   :  { %v970_v35 = vadd.f32 %v969_v2, %v2084_v37  ;;  %v2297_v37 = vld [vmem:[%s2428_s3 + $0x1c] ss:$12 sps:$4 sm:$0xff]   ;;  %v2444_v2 = vld [vmem:[#allocation7_spill] sm:$0xff] }
 0x536   :  { %1720 = vtanh.f32 %v970_v35 }
 0x537   :  { %1722 = vrcp.f32 %v963_v55 }
 0x540   :  { %v1721_v9 = vpop.eup %1720 }
 0x541   :  { %v972_v3 = vsub.f32 %v2239_v45, %v1721_v9  ;;  %v1723_v44 = vpop.eup %1722 }
 0x543   :  { %v973_v60 = vmul.f32 %v1723_v44, %v972_v3 }
 0x545   :  { %v2283_v23 = vadd.f32 %v1721_v9, %v973_v60 }
 0x547   :  { %v979_v54 = vpack.c.bf16 %v2283_v23, %v2283_v23 }
 0x549   :  { %1013 = vmatmul.mubr.bf16.vlgmr.msra.gmra.mrb[36].mxu0 %v979_v54  ;;  %1587 = vmatmul.mubr.bf16.vlgmr.msra.gmra.mrb[28].mxu1 %v979_v54 }
 0x54a   :  { %1088 = vmatpush1.bf16.msra.mxu0 %v2290_v50  ;;  %1591 = vmatpush3.bf16.msra.mxu1 %v1901_v17 }
 0x54b   :  { %1089 = vmatprep.subr.bf16.mxu0 %v2297_v37  ;;  %1592 = vmatprep.subr.bf16.mxu1 %v2442_v49 }
 0x54c   :  { %1119 = vmatprep.mubr.bf16.mxu0 %v2443_v59  ;;  %1606 = vmatprep.mubr.msk.bf16.mxu1 %vm1779_vm1, %v2442_v49 }
 0x54e   :  { %1090 = vmatpush1.bf16.msra.mxu0 %v1853_v7  ;;  %1593 = vmatpush3.bf16.msra.mxu1 %v1908_v18  ;;  %v1760_v7 = vld [vmem:[%s2428_s3 + $0x4] ss:$12 sps:$4 sm:$0xff]  }
 0x54f   :  { %1091 = vmatprep.subr.bf16.mxu0 %v1860_v8  ;;  %1594 = vmatprep.subr.bf16.mxu1 %v2442_v49 }
 0x552   :  { %1092 = vmatpush1.bf16.msra.mxu0 %v1868_v10  ;;  %1595 = vmatpush3.bf16.msra.mxu1 %v1934_v22 }
 0x553   :  { %1093 = vmatprep.subr.bf16.mxu0 %v1878_v12  ;;  %1596 = vmatprep.subr.bf16.mxu1 %v2442_v49 }
 0x556   :  { %1094 = vmatpush1.bf16.msra.mxu0 %v1884_v13  ;;  %1597 = vmatpush3.bf16.msra.mxu1 %v1953_v25 }
 0x557   :  { %1095 = vmatprep.subr.bf16.mxu0 %v1894_v15  ;;  %1598 = vmatprep.subr.bf16.mxu1 %v2442_v49 }
 0x55a   :  { %1096 = vmatpush1.bf16.msra.mxu0 %v1915_v19  ;;  %1599 = vmatpush3.bf16.msra.mxu1 %v1975_v28 }
 0x55b   :  { %1097 = vmatprep.subr.bf16.mxu0 %v1922_v20  ;;  %1600 = vmatprep.subr.bf16.mxu1 %v2442_v49 }
 0x55e   :  { %1098 = vmatpush1.bf16.msra.mxu0 %v1927_v21  ;;  %1601 = vmatpush3.bf16.msra.mxu1 %v1990_v30 }
 0x55f   :  { %1099 = vmatprep.subr.bf16.mxu0 %v1945_v24  ;;  %1602 = vmatprep.subr.bf16.mxu1 %v2442_v49 }
 0x562   :  { %1100 = vmatpush1.bf16.msra.mxu0 %v1961_v26  ;;  %1603 = vmatpush3.bf16.msra.mxu1 %v1999_v32 }
 0x563   :  { %1101 = vmatprep.subr.bf16.mxu0 %v1968_v27  ;;  %1604 = vmatprep.subr.bf16.mxu1 %v2442_v49 }
 0x566   :  { %1102 = vmatpush1.bf16.msra.mxu0 %v1981_v29  ;;  %1605 = vmatpush3.bf16.msra.mxu1 %v2009_v33 }
 0x567   :  { %1194 = vmatprep.subr.bf16.mxu0 %v1760_v7  ;;  %1610 = vmatprep.subr.bf16.mxu1 %v2442_v49  ;;  %v2445_v7 = vld [vmem:[#allocation5_spill] sm:$0xff] }
 0x61c   :  { %v1014_v8 = vpop.f32.mrb[36].mxu0  ;;  %v1055_v10 = vpop.f32.mrb[28].mxu1 }
 0x61d   :  { %v1061_v12 = vadd.f32 %v1014_v8, %v2076_v14  ;;  %v1016_v13 = vpop.f32.mrb[37].mxu0  ;;  %v1588_v15 = vpop.f32.mrb[29].mxu1  ;;  %v1075_v46 = vadd.f32 %v2103_v39, %v1055_v10 }
 0x61e   :  { %v1062_v17 = vadd.f32 %v1016_v13, %v2078_v34  ;;  %v1018_v18 = vpop.f32.mrb[38].mxu0  ;;  %v1058_v19 = vpop.f32.mrb[30].mxu1 }
 0x61f   :  { %v1375_v20 = vmul.f32 -1.442695, %v1061_v12  ;;  %v1019_v21 = vpop.f32.mrb[39].mxu0  ;;  %v1589_v22 = vpop.f32.mrb[31].mxu1 }
 0x620   :  { %v1376_v24 = vmul.f32 -1.442695, %v1062_v17  ;;  %v2446_v22 = vld [vmem:[#allocation8_spill] sm:$0xff] }
 0x621   :  { %1724 = vpow2.f32 %v1375_v20 }
 0x622   :  { %1726 = vpow2.f32 %v1376_v24 }
 0x62b   :  { %v1725_v26 = vpop.eup %1724 }
 0x62c   :  { %v1069_v27 = vadd.f32 1.0, %v1725_v26  ;;  %v1727_v29 = vpop.eup %1726 }
 0x62d   :  { %v1070_v52 = vadd.f32 1.0, %v1727_v29 }
 0x62e   :  { %1728 = vrcp.f32 %v1069_v27 }
 0x638   :  { %v1729_v57 = vpop.eup %1728 }
 0x639   :  { %v1076_v14 = vmul.f32 %v1729_v57, %v1075_v46 }
 0x63b   :  { %v1077_v31 = vadd.f32 %v1076_v14, %v2090_v47  ;;  %v1761_v47 = vld [vmem:[%s2428_s3 + $0x8] ss:$12 sps:$4 sm:$0xff]  }
 0x63d   :  { %1730 = vtanh.f32 %v1077_v31 }
 0x63e   :  { %1732 = vrcp.f32 %v1070_v52 }
 0x647   :  { %v1731_v34 = vpop.eup %1730 }
 0x648   :  { %v1079_v38 = vsub.f32 %v2283_v23, %v1731_v34  ;;  %v1733_v45 = vpop.eup %1732 }
 0x64a   :  { %v1080_v53 = vmul.f32 %v1733_v45, %v1079_v38 }
 0x64c   :  { %v2339_v5 = vadd.f32 %v1731_v34, %v1080_v53 }
 0x64e   :  { %v1086_v6 = vpack.c.bf16 %v2339_v5, %v2339_v5 }
 0x650   :  { %1120 = vmatmul.mubr.bf16.vlgmr.msra.gmra.mrb[40].mxu0 %v1086_v6  ;;  %1607 = vmatmul.mubr.bf16.vlgmr.msra.gmra.mrb[32].mxu1 %v1086_v6 }
 0x651   :  { %1195 = vmatpush1.bf16.msra.mxu0 %v2290_v50  ;;  %1611 = vmatpush3.bf16.msra.mxu1 %v1761_v47 }
 0x652   :  { %1196 = vmatprep.subr.bf16.mxu0 %v2297_v37  ;;  %1612 = vmatprep.subr.bf16.mxu1 %v2442_v49 }
 0x653   :  { %1226 = vmatprep.mubr.bf16.mxu0 %v2443_v59  ;;  %1626 = vmatprep.mubr.msk.bf16.mxu1 %vm1779_vm1, %v2442_v49  ;;  %v1765_v59 = vld [vmem:[%s2428_s3 + $0x30] ss:$12 sps:$4 sm:$0xff]  }
 0x655   :  { %1197 = vmatpush1.bf16.msra.mxu0 %v1762_v61  ;;  %1613 = vmatpush3.bf16.msra.mxu1 %v1763_v63  ;;  %v2447_v61 = vld [vmem:[#allocation6_spill] sm:$0xff] }
 0x656   :  { %1198 = vmatprep.subr.bf16.mxu0 %v1764_v36  ;;  %1614 = vmatprep.subr.bf16.mxu1 %v2442_v49 }
 0x659   :  { %1199 = vmatpush1.bf16.msra.mxu0 %v1765_v59  ;;  %1615 = vmatpush3.bf16.msra.mxu1 %v1766_v58 }
 0x65a   :  { %1200 = vmatprep.subr.bf16.mxu0 %v1767_v48  ;;  %1616 = vmatprep.subr.bf16.mxu1 %v2442_v49 }
 0x65d   :  { %1201 = vmatpush1.bf16.msra.mxu0 %v1768_v11  ;;  %1617 = vmatpush3.bf16.msra.mxu1 %v1953_v25  ;;  %v1772_v25 = vld [vmem:[%s2428_s3 + $0x78] ss:$12 sps:$4 sm:$0xff]   ;;  %v1381_v11 = vld [vmem:[%s2431_s5] ss:$0 sm:$0xff] }
 0x65e   :  { %1202 = vmatprep.subr.bf16.mxu0 %v1769_v56  ;;  %1618 = vmatprep.subr.bf16.mxu1 %v2442_v49 }
 0x661   :  { %1203 = vmatpush1.bf16.msra.mxu0 %v1770_v40  ;;  %1619 = vmatpush3.bf16.msra.mxu1 %v1975_v28  ;;  %v1774_v28 = vld [vmem:[%s2428_s3 + $0x90] ss:$12 sps:$4 sm:$0xff]  }
 0x662   :  { %1204 = vmatprep.subr.bf16.mxu0 %v1771_v41  ;;  %1620 = vmatprep.subr.bf16.mxu1 %v2442_v49 }
 0x665   :  { %1205 = vmatpush1.bf16.msra.mxu0 %v1772_v25  ;;  %1621 = vmatpush3.bf16.msra.mxu1 %v1990_v30  ;;  %v1776_v30 = vld [vmem:[%s2428_s3 + $0xa8] ss:$12 sps:$4 sm:$0xff]  }
 0x666   :  { %1206 = vmatprep.subr.bf16.mxu0 %v1773_v42  ;;  %1622 = vmatprep.subr.bf16.mxu1 %v2442_v49 }
 0x669   :  { %1207 = vmatpush1.bf16.msra.mxu0 %v1774_v28  ;;  %1623 = vmatpush3.bf16.msra.mxu1 %v1999_v32 }
 0x66a   :  { %1208 = vmatprep.subr.bf16.mxu0 %v1775_v1  ;;  %1624 = vmatprep.subr.bf16.mxu1 %v2442_v49 }
 0x66d   :  { %1209 = vmatpush1.bf16.msra.mxu0 %v1776_v30  ;;  %1625 = vmatpush3.bf16.msra.mxu1 %v2009_v33 }
 0x723   :  { %v1121_v16 = vpop.f32.mrb[40].mxu0  ;;  %v1162_v4 = vpop.f32.mrb[32].mxu1 }
 0x724   :  { %v1168_v43 = vadd.f32 %v1121_v16, %v2092_v51  ;;  %v1123_v62 = vpop.f32.mrb[41].mxu0  ;;  %v1608_v32 = vpop.f32.mrb[33].mxu1  ;;  %v1182_v50 = vadd.f32 %v2103_v39, %v1162_v4 }
 0x725   :  { %v1169_v35 = vadd.f32 %v1123_v62, %v2444_v2  ;;  %v1125_v55 = vpop.f32.mrb[42].mxu0  ;;  %v1165_v9 = vpop.f32.mrb[34].mxu1 }
 0x726   :  { %v1377_v3 = vmul.f32 -1.442695, %v1168_v43  ;;  %v1126_v44 = vpop.f32.mrb[43].mxu0  ;;  %v1609_v49 = vpop.f32.mrb[35].mxu1 }
 0x727   :  { %v1378_v60 = vmul.f32 -1.442695, %v1169_v35 }
 0x728   :  { %1734 = vpow2.f32 %v1377_v3 }
 0x729   :  { %1736 = vpow2.f32 %v1378_v60 }
 0x732   :  { %v1735_v23 = vpop.eup %1734 }
 0x733   :  { %v1176_v54 = vadd.f32 1.0, %v1735_v23  ;;  %v1737_v33 = vpop.eup %1736 }
 0x734   :  { %v1177_v10 = vadd.f32 1.0, %v1737_v33 }
 0x735   :  { %1738 = vrcp.f32 %v1176_v54 }
 0x73f   :  { %v1739_v37 = vpop.eup %1738 }
 0x740   :  { %v1183_v51 = vmul.f32 %v1739_v37, %v1182_v50 }
 0x742   :  { %v1184_v8 = vadd.f32 %v1183_v51, %v2445_v7 }
 0x744   :  { %1740 = vtanh.f32 %v1184_v8 }
 0x745   :  { %1742 = vrcp.f32 %v1177_v10 }
 0x74e   :  { %v1741_v12 = vpop.eup %1740 }
 0x74f   :  { %v1186_v13 = vsub.f32 %v2339_v5, %v1741_v12  ;;  %v1743_v15 = vpop.eup %1742 }
 0x751   :  { %v1187_v17 = vmul.f32 %v1743_v15, %v1186_v13 }
 0x753   :  { %v1188_v18 = vadd.f32 %v1741_v12, %v1187_v17 }
 0x755   :  { %v1193_v19 = vpack.c.bf16 %v1188_v18, %v1188_v18 }
 0x757   :  { %1227 = vmatmul.mubr.bf16.vlgmr.msra.gmra.mrb[44].mxu0 %v1193_v19  ;;  %1627 = vmatmul.mubr.bf16.vlgmr.msra.gmra.mrb[36].mxu1 %v1193_v19 }
 0x82a   :  { %v1228_v20 = vpop.f32.mrb[44].mxu0  ;;  %v1269_v21 = vpop.f32.mrb[36].mxu1 }
 0x82b   :  { %v1275_v24 = vadd.f32 %v1228_v20, %v2446_v22  ;;  %v1230_v26 = vpop.f32.mrb[45].mxu0  ;;  %v1628_v27 = vpop.f32.mrb[37].mxu1  ;;  %v1289_v5 = vadd.f32 %v2103_v39, %v1269_v21  ;;  %v1311_v39 = vstv %s2432_s6 }
 0x82c   :  { %v1276_v29 = vadd.f32 %v1230_v26, %v2098_v0  ;;  %v1232_v46 = vpop.f32.mrb[46].mxu0  ;;  %v1272_v57 = vpop.f32.mrb[38].mxu1 }
 0x82d   :  { %v1379_v14 = vmul.f32 -1.442695, %v1275_v24  ;;  %v1233_v31 = vpop.f32.mrb[47].mxu0  ;;  %v1629_v52 = vpop.f32.mrb[39].mxu1 }
 0x82e   :  { %v1380_v34 = vmul.f32 -1.442695, %v1276_v29 }
 0x82f   :  { %1744 = vpow2.f32 %v1379_v14 }
 0x830   :  { %1746 = vpow2.f32 %v1380_v34 }
 0x839   :  { %v1745_v38 = vpop.eup %1744 }
 0x83a   :  { %v1283_v45 = vadd.f32 1.0, %v1745_v38  ;;  %v1747_v53 = vpop.eup %1746 }
 0x83b   :  { %v1284_v36 = vadd.f32 1.0, %v1747_v53 }
 0x83c   :  { %1748 = vrcp.f32 %v1283_v45 }
 0x846   :  { %v1749_v6 = vpop.eup %1748 }
 0x847   :  { %v1290_v47 = vmul.f32 %v1749_v6, %v1289_v5 }
 0x849   :  { %v1291_v63 = vadd.f32 %v1290_v47, %v2447_v61 }
 0x84b   :  { %1750 = vtanh.f32 %v1291_v63 }
 0x84c   :  { %1752 = vrcp.f32 %v1284_v36 }
 0x855   :  { %v1751_v0 = vpop.eup %1750 }
 0x856   :  { %v1293_v59 = vsub.f32 %v1188_v18, %v1751_v0  ;;  %v1753_v58 = vpop.eup %1752 }
 0x858   :  { %v1294_v48 = vmul.f32 %v1753_v58, %v1293_v59 }
 0x85a   :  { %v1295_v56 = vadd.f32 %v1751_v0, %v1294_v48 }
 0x85c   :  { %v1307_v40 = vmul.f32 %v1381_v11, %v1295_v56 }
 0x85e   :  { %1308 = vadd.xlane.f32.xlu0 %v1307_v40 }
 0x8eb   :  { %v1309_v41 = vpop.xlane.xlu0 %1308 }
 0x8ec   :  { %v1312_v25 = vadd.f32 %v1311_v39, %v1309_v41 }
 0x8ee   :  { %v1382_v42 = vmul.f32 -1.442695, %v1312_v25 }
 0x8f0   :  { %1754 = vpow2.f32 %v1382_v42 }
 0x8fa   :  { %v1755_v28 = vpop.eup %1754 }
 0x8fb   :  { %v1316_v1 = vadd.f32 1.0, %v1755_v28 }
 0x8fd   :  { %1756 = vrcp.f32 %v1316_v1 }
 0x907   :  { %v1757_v30 = vpop.eup %1756 }
 0x908   :  { %1320 = vst.msk [vmem:[%s2433_s7] sm:$0xff] %vm1319_vm2, %v1757_v30 }

</bundles_post_ra>
